<compile_context>
chip_gen: v5e
topology: v5e:2x2
jax: 0.10.0
libtpu: 0.0.40
codegen_flags: <defaults>
</compile_context>

<pallas_src>
import functools
import numpy as np
import jax
import jax.numpy as jnp
from jax.experimental import pallas as pl
from jax.experimental.pallas import tpu as pltpu

NEG_SLOPE = 0.01   # F.leaky_relu default negative_slope


# ---------------------------------------------------------------------------
# Pallas kernels
# ---------------------------------------------------------------------------
def _enc_conv_kernel(x_ref, w01_ref, w2z_ref, b_ref, o_ref, *, l_out, extra):
    """Conv1d(k=3, s=2, p=1) + LeakyReLU for one batch element.

    x_ref : (T, 2*C_in) bf16  pair-packed padded input, T >= l_out+1,
            row j = [x_pad[2j] | x_pad[2j+1]]  (channels on lanes)
    w01   : (2*C_in, C_out)  bf16   [tap0 ; tap1]
    w2z   : (2*C_in, C_out)  bf16   [tap2 ; 0]
    b     : (1, C_out)       f32
    o_ref : (l_out + extra, C_out) bf16 ; the `extra` trailing rows are written
            as zeros so the output doubles as the pre-padded U-net skip operand.
    """
    x = x_ref[...]
    acc = jnp.dot(x[:l_out, :], w01_ref[...], preferred_element_type=jnp.float32)
    acc = acc + jnp.dot(x[1:l_out + 1, :], w2z_ref[...],
                        preferred_element_type=jnp.float32)
    y = acc + b_ref[...]
    y = jnp.where(y >= 0, y, NEG_SLOPE * y)
    if extra:
        y = jnp.concatenate([y, jnp.zeros((extra, y.shape[1]), y.dtype)], axis=0)
    o_ref[...] = y.astype(o_ref.dtype)


def _dec_convT_kernel(*refs, n_groups, act, rows_out, pad_row):
    """Polyphase ConvTranspose1d(k=3, s=2, p=1, output_padding=1) + activation.

    refs = x_0..x_{G-1}, wc_0, wn_0, ..., wc_{G-1}, wn_{G-1}, b, out
      x_g  : (R_g >= rows_out+1, C_g) bf16  (rows past the data are zero)
      wc_g : (C_g, 2*C_out) bf16  [tap1 | tap2]  (current input position)
      wn_g : (C_g, 2*C_out) bf16  [0    | tap0]  (next input position)
      b    : (1, 2*C_out)   f32
      out  : (rows_out [+1 zero row], 2*C_out)  pair-packed [even | odd] phases
    """
    o_ref = refs[-1]
    b_ref = refs[-2]
    acc = None
    for g in range(n_groups):
        x = refs[g][...]
        wc = refs[n_groups + 2 * g][...]
        wn = refs[n_groups + 2 * g + 1][...]
        part = jnp.dot(x[:rows_out, :], wc, preferred_element_type=jnp.float32)
        part = part + jnp.dot(x[1:rows_out + 1, :], wn,
                              preferred_element_type=jnp.float32)
        acc = part if acc is None else acc + part
    y = acc + b_ref[...]
    if act == "leaky":
        y = jnp.where(y >= 0, y, NEG_SLOPE * y)
    else:  # sigmoid; divide goes to the EUP slot
        y = pl.reciprocal(1.0 + jnp.exp(-y), approx=True)
    if pad_row:  # emit the "next-tap" zero row the next decoder stage needs
        y = jnp.concatenate([y, jnp.zeros((1, y.shape[1]), y.dtype)], axis=0)
    o_ref[...] = y.astype(o_ref.dtype)


# ---------------------------------------------------------------------------
# pallas_call wrappers
# ---------------------------------------------------------------------------
def _pack_pairs(x, t_min):
    """Left-pad 1 row, right-pad with zeros to an even length >= 2*t_min, then
    pair-pack (B, 2T, C) -> (B, T, 2C).  The reshape is contiguous (free)."""
    B, N, C = x.shape
    total = max(N + 1, 2 * t_min)
    total += total % 2
    xp = jnp.pad(x, ((0, 0), (1, total - 1 - N), (0, 0)))
    return xp.reshape(B, total // 2, 2 * C)


def enc_block(x, p, l_in, *, extra_rows=0):
    """x: (B, N>=l_in, C_in) bf16 channels-last; valid data in first l_in rows,
    any rows past l_in are zero.  Returns ((B, l_out+extra_rows, C_out), l_out)."""
    B, _, c_in = x.shape
    c_out = p["w01"].shape[1]
    l_out = (l_in - 1) // 2 + 1
    xp = _pack_pairs(x, l_out + 1)                # (B, T, 2*C_in)
    t = xp.shape[1]
    rows = l_out + extra_rows

    flops = 2 * 2 * l_out * (2 * c_in) * c_out * B
    bytes_acc = int(xp.size * 2 + p["w01"].size * 2 + p["w2z"].size * 2
                    + p["b"].size * 4 + B * rows * c_out * 2)
    kern = functools.partial(_enc_conv_kernel, l_out=l_out, extra=extra_rows)
    y = pl.pallas_call(
        kern,
        out_shape=jax.ShapeDtypeStruct((B, rows, c_out), jnp.bfloat16),
        grid=(B,),
        in_specs=[
            pl.BlockSpec((None, t, 2 * c_in), lambda b: (b, 0, 0)),
            pl.BlockSpec((2 * c_in, c_out), lambda b: (0, 0)),
            pl.BlockSpec((2 * c_in, c_out), lambda b: (0, 0)),
            pl.BlockSpec((1, c_out), lambda b: (0, 0)),
        ],
        out_specs=pl.BlockSpec((None, rows, c_out), lambda b: (b, 0, 0)),
        compiler_params=pltpu.CompilerParams(dimension_semantics=("parallel",)),
        cost_estimate=pl.CostEstimate(flops=flops, transcendentals=0,
                                      bytes_accessed=bytes_acc),
    )(xp, p["w01"], p["w2z"], p["b"])
    return y, l_out


def dec_block(inputs, branched, wp, *, rows_out, act, out_dtype, pad_row):
    """Stacked (signal, noise) polyphase ConvTranspose1d stage.

    inputs : list of channels-last inputs, each with >= rows_out+1 rows (rows
             past the real data are zero);
             branched[i]==True  -> shape (2, B, R_i, C_i)   (per-branch data)
             branched[i]==False -> shape (B, R_i, C_i)      (shared skip/latent)
    wp     : {"wc": [(2, C_i, 2*C_out)...], "wn": [...], "b": (2, 1, 2*C_out)}
    returns (2, B, rows_out[+1], 2*C_out) pair-packed [even|odd] output.
    """
    nb = wp["b"].shape[0]
    main = inputs[0]
    B = main.shape[1] if branched[0] else main.shape[0]
    c2 = wp["b"].shape[-1]
    n_groups = len(inputs)
    rows_total = rows_out + (1 if pad_row else 0)

    in_specs, operands = [], []
    for arr, br in zip(inputs, branched):
        R, C = arr.shape[-2], arr.shape[-1]
        assert R >= rows_out + 1, (R, rows_out)
        if br:
            in_specs.append(pl.BlockSpec((None, None, R, C),
                                         lambda i, j: (i, j, 0, 0)))
        else:
            in_specs.append(pl.BlockSpec((None, R, C), lambda i, j: (j, 0, 0)))
        operands.append(arr)
    for wc, wn in zip(wp["wc"], wp["wn"]):
        cg = wc.shape[1]
        in_specs.append(pl.BlockSpec((None, cg, c2), lambda i, j: (i, 0, 0)))
        in_specs.append(pl.BlockSpec((None, cg, c2), lambda i, j: (i, 0, 0)))
        operands += [wc, wn]
    in_specs.append(pl.BlockSpec((None, 1, c2), lambda i, j: (i, 0, 0)))
    operands.append(wp["b"])

    flops = nb * B * sum(2 * 2 * rows_out * a.shape[-1] * c2 for a in inputs)
    bytes_acc = int(sum(a.size * np.dtype(a.dtype).itemsize for a in operands)
                    + nb * B * rows_total * c2 * np.dtype(out_dtype).itemsize)
    trans = nb * B * rows_out * c2 if act == "sigmoid" else 0

    kern = functools.partial(_dec_convT_kernel, n_groups=n_groups, act=act,
                             rows_out=rows_out, pad_row=pad_row)
    return pl.pallas_call(
        kern,
        out_shape=jax.ShapeDtypeStruct((nb, B, rows_total, c2), out_dtype),
        grid=(nb, B),
        in_specs=in_specs,
        out_specs=pl.BlockSpec((None, None, rows_total, c2),
                               lambda i, j: (i, j, 0, 0)),
        compiler_params=pltpu.CompilerParams(
            dimension_semantics=("parallel", "parallel")),
        cost_estimate=pl.CostEstimate(flops=flops, transcendentals=trans,
                                      bytes_accessed=bytes_acc),
    )(*operands)


# ---------------------------------------------------------------------------
# one-time weight pre-packing (done at init, never per forward call)
# ---------------------------------------------------------------------------
def _pack_conv(w, b):
    # PyTorch Conv1d weight (C_out, C_in, 3) -> pair-packed tap matrices.
    w0, w1, w2 = (jnp.transpose(w[:, :, t]) for t in range(3))      # (C_in, C_out)
    zeros = jnp.zeros_like(w2)
    return {"w01": jnp.concatenate([w0, w1], axis=0).astype(jnp.bfloat16),
            "w2z": jnp.concatenate([w2, zeros], axis=0).astype(jnp.bfloat16),
            "b": b.reshape(1, -1).astype(jnp.float32)}


def _pack_convT(w, b, split=None):
    # PyTorch ConvTranspose1d weight (C_in, C_out, 3); k=3, s=2, p=1, op=1:
    #   even output j=2m   : x[m]   @ W1
    #   odd  output j=2m+1 : x[m+1] @ W0 + x[m] @ W2
    c_in, c_out, _ = w.shape
    w_cur = jnp.concatenate([w[:, :, 1], w[:, :, 2]], axis=1)        # (C_in, 2*C_out)
    w_nxt = jnp.concatenate([jnp.zeros((c_in, c_out), w.dtype), w[:, :, 0]], axis=1)
    w_cur = w_cur.astype(jnp.bfloat16)
    w_nxt = w_nxt.astype(jnp.bfloat16)
    b2 = jnp.concatenate([b, b]).reshape(1, 2 * c_out).astype(jnp.float32)
    if split is None:
        return {"wc": [w_cur], "wn": [w_nxt], "b": b2}
    # split input-channel rows into (main, skip) groups so the U-net concat is
    # folded into the matmul instead of an XLA concatenate.
    return {"wc": [w_cur[:split], w_cur[split:]],
            "wn": [w_nxt[:split], w_nxt[split:]], "b": b2}


def _stack_branches(sig, noi):
    return {"wc": [jnp.stack([a, c]) for a, c in zip(sig["wc"], noi["wc"])],
            "wn": [jnp.stack([a, c]) for a, c in zip(sig["wn"], noi["wn"])],
            "b": jnp.stack([sig["b"], noi["b"]])}


def init_params(key, input_channels=1, latent_dim=16):
    """Raw PyTorch-layout parameters, deterministic uniform(-1/sqrt(fan), +) init."""
    ks = iter(jax.random.split(key, 18))

    def conv(c_out, c_in, k=3):
        bound = 1.0 / np.sqrt(c_in * k)
        return (jax.random.uniform(next(ks), (c_out, c_in, k), jnp.float32, -bound, bound),
                jax.random.uniform(next(ks), (c_out,), jnp.float32, -bound, bound))

    def convT(c_in, c_out, k=3):
        bound = 1.0 / np.sqrt(c_in * k)
        return (jax.random.uniform(next(ks), (c_in, c_out, k), jnp.float32, -bound, bound),
                jax.random.uniform(next(ks), (c_out,), jnp.float32, -bound, bound))

    # TODO(synk): bn1..bnNoi2 BatchNorm1d layers exist in the PyTorch module but
    # are never applied inside forward(), so no BN parameters are needed here.
    return {
        "enc1": conv(16, input_channels),
        "enc2": conv(32, 16),
        "enc3": conv(latent_dim, 32),
        "decSig1": convT(latent_dim, 32),
        "decSig2": convT(64, 16),
        "decSig3": convT(32, 1),
        "decNoi1": convT(latent_dim, 32),
        "decNoi2": convT(64, 16),
        "decNoi3": convT(32, 1),
    }


def pack_params(raw):
    return {
        "enc1": _pack_conv(*raw["enc1"]),
        "enc2": _pack_conv(*raw["enc2"]),
        "enc3": _pack_conv(*raw["enc3"]),
        "dec1": _stack_branches(_pack_convT(*raw["decSig1"]),
                                _pack_convT(*raw["decNoi1"])),
        "dec2": _stack_branches(_pack_convT(*raw["decSig2"], split=32),
                                _pack_convT(*raw["decNoi2"], split=32)),
        "dec3": _stack_branches(_pack_convT(*raw["decSig3"], split=16),
                                _pack_convT(*raw["decNoi3"], split=16)),
    }


# ---------------------------------------------------------------------------
# forward pass (matches Conv1DUnetBN2.forward)
# ---------------------------------------------------------------------------
def apply_fn(packed, x):
    """x: (B, C_in, L) in PyTorch NCL layout -> (signal, noise), each (B, 8*L3)."""
    B, _, L = x.shape
    # The only layout transpose in the whole forward: NCL -> channels-last.
    h = jnp.transpose(x, (0, 2, 1)).astype(jnp.bfloat16)

    # Encoder.  Each stage emits trailing zero rows so its output is ALSO the
    # already-padded U-net skip operand (no jnp.pad between kernels, and the
    # skip tensors are written to HBM exactly once).
    x1, L1 = enc_block(h, packed["enc1"], L, extra_rows=3)    # (B, L1+3, 16)
    x2, L2 = enc_block(x1, packed["enc2"], L1, extra_rows=2)  # (B, L2+2, 32)
    x3, L3 = enc_block(x2, packed["enc3"], L2, extra_rows=1)  # (B, L3+1, latent)

    # U-net skip-length constraints of the PyTorch forward (torch.cat would
    # raise otherwise), checked at trace time on static shapes.
    assert 2 * L3 == L2 + 1 and 4 * L3 == L1 + 2, (L1, L2, L3)

    # --- decoder stage 1: ConvT(latent->32), both branches share x3 ---------
    d1 = dec_block([x3], [False], packed["dec1"], rows_out=L3,
                   act="leaky", out_dtype=jnp.bfloat16, pad_row=True)
    h1 = d1.reshape(2, B, 2 * (L3 + 1), 32)       # free pair-unpack; tail rows 0

    # --- decoder stage 2: ConvT(64->16) with x2 skip folded into the matmul --
    d2 = dec_block([h1, x2], [True, False], packed["dec2"], rows_out=2 * L3,
                   act="leaky", out_dtype=jnp.bfloat16, pad_row=True)
    h2 = d2.reshape(2, B, 2 * (2 * L3 + 1), 16)

    # --- decoder stage 3: ConvT(32->1) + sigmoid, x1 skip folded in ----------
    d3 = dec_block([h2, x1], [True, False], packed["dec3"], rows_out=4 * L3,
                   act="sigmoid", out_dtype=jnp.float32, pad_row=False)
    out = d3.reshape(2, B, 8 * L3)
    return out[0], out[1]     # == PyTorch .squeeze() for B > 1


# ---------------------------------------------------------------------------
# pure-XLA f32 reference of the PyTorch forward (for the correctness check)
# ---------------------------------------------------------------------------
def reference_forward(raw, x):
    def conv(h, w, b, stride, pad):
        y = jax.lax.conv_general_dilated(
            h, w, window_strides=(stride,), padding=[(pad, pad)],
            dimension_numbers=("NCH", "OIH", "NCH"))
        return y + b[None, :, None]

    def convT(h, w, b, stride, pad, out_pad):
        k = w.shape[-1]
        w_conv = jnp.transpose(jnp.flip(w, axis=-1), (1, 0, 2))
        y = jax.lax.conv_general_dilated(
            h, w_conv, window_strides=(1,),
            padding=[(k - 1 - pad, k - 1 - pad + out_pad)],
            lhs_dilation=(stride,), dimension_numbers=("NCH", "OIH", "NCH"))
        return y + b[None, :, None]

    lrelu = lambda v: jnp.where(v >= 0, v, NEG_SLOPE * v)
    sigmoid = lambda v: 1.0 / (1.0 + jnp.exp(-v))

    x1 = lrelu(conv(x, *raw["enc1"], 2, 1))
    x2 = lrelu(conv(x1, *raw["enc2"], 2, 1))
    x3 = lrelu(conv(x2, *raw["enc3"], 2, 1))

    def decode(k1, k2, k3):
        s1 = lrelu(convT(x3, *raw[k1], 2, 1, 1))
        x2p = jnp.pad(x2, ((0, 0), (0, 0), (0, 1)))
        s2 = lrelu(convT(jnp.concatenate([s1, x2p], axis=1), *raw[k2], 2, 1, 1))
        x1p = jnp.pad(x1, ((0, 0), (0, 0), (0, 2)))
        out = sigmoid(convT(jnp.concatenate([s2, x1p], axis=1), *raw[k3], 2, 1, 1))
        return out[:, 0, :]

    return (decode("decSig1", "decSig2", "decSig3"),
            decode("decNoi1", "decNoi2", "decNoi3"))


# ---------------------------------------------------------------------------
if __name__ == "__main__":
    # L must satisfy the module's U-net skip-length constraints (e.g. L=16 does
    # not: the torch.cat in forward() would fail).  L=12 -> 6 -> 3 -> 2 -> 16.
    B, C_IN, L = 2, 1, 12
    LATENT = 16

    root = jax.random.PRNGKey(0)
    kparam, kx = jax.random.split(root)
    raw = init_params(kparam, input_channels=C_IN, latent_dim=LATENT)
    packed = pack_params(raw)
    x = jax.random.normal(kx, (B, C_IN, L), jnp.float32)

    fwd = jax.jit(apply_fn)
    signal, noise = fwd(packed, x)
    jax.block_until_ready((signal, noise))

    ref_sig, ref_noi = jax.jit(reference_forward)(raw, x)
    jax.block_until_ready((ref_sig, ref_noi))

    assert signal.shape == ref_sig.shape == (B, 16), (signal.shape, ref_sig.shape)
    assert noise.shape == ref_noi.shape == (B, 16), (noise.shape, ref_noi.shape)
    assert np.all(np.isfinite(np.asarray(signal)))
    assert np.all(np.isfinite(np.asarray(noise)))
    # kernel path is bf16-matmul / f32-accumulate; reference is pure f32.
    assert np.allclose(np.asarray(signal), np.asarray(ref_sig), atol=5e-2), \
        float(np.max(np.abs(np.asarray(signal) - np.asarray(ref_sig))))
    assert np.allclose(np.asarray(noise), np.asarray(ref_noi), atol=5e-2), \
        float(np.max(np.abs(np.asarray(noise) - np.asarray(ref_noi))))
    print("KERNEL_OK")
</pallas_src>

<mosaic_0001>
module attributes {stable_mosaic.version = 11 : i64} {
  func.func @_dec_convT_kernel(%arg0: i32, %arg1: i32, %arg2: memref<1x3x16xbf16, #tpu.memory_space<vmem>>, %arg3: memref<1x16x64xbf16, #tpu.memory_space<vmem>>, %arg4: memref<1x16x64xbf16, #tpu.memory_space<vmem>>, %arg5: memref<1x1x64xf32, #tpu.memory_space<vmem>>, %arg6: memref<1x1x3x64xbf16, #tpu.memory_space<vmem>>) attributes {dimension_semantics = [#tpu.dimension_semantics<parallel>, #tpu.dimension_semantics<parallel>], iteration_bounds = array<i64: 2, 2>, scalar_prefetch = 0 : i64, scratch_operands = 0 : i64, tpu.core_type = #tpu.core_type<tc>, window_params = [{transform_indices = @transform_0, window_bounds = array<i64: 1, 3, 16>}, {transform_indices = @transform_1, window_bounds = array<i64: 1, 16, 64>}, {transform_indices = @transform_2, window_bounds = array<i64: 1, 16, 64>}, {transform_indices = @transform_3, window_bounds = array<i64: 1, 1, 64>}, {transform_indices = @transform_4, window_bounds = array<i64: 1, 1, 3, 64>}]} {
    %c0 = arith.constant 0 : index
    %c0_0 = arith.constant 0 : index
    %c0_1 = arith.constant 0 : index
    %0 = vector.load %arg2[%c0, %c0_0, %c0_1] : memref<1x3x16xbf16, #tpu.memory_space<vmem>>, vector<1x3x16xbf16>
    %1 = vector.shape_cast %0 : vector<1x3x16xbf16> to vector<3x16xbf16>
    %c0_2 = arith.constant 0 : index
    %c0_3 = arith.constant 0 : index
    %c0_4 = arith.constant 0 : index
    %2 = vector.load %arg3[%c0_2, %c0_3, %c0_4] : memref<1x16x64xbf16, #tpu.memory_space<vmem>>, vector<1x16x64xbf16>
    %3 = vector.shape_cast %2 : vector<1x16x64xbf16> to vector<16x64xbf16>
    %c0_5 = arith.constant 0 : index
    %c0_6 = arith.constant 0 : index
    %c0_7 = arith.constant 0 : index
    %4 = vector.load %arg4[%c0_5, %c0_6, %c0_7] : memref<1x16x64xbf16, #tpu.memory_space<vmem>>, vector<1x16x64xbf16>
    %5 = vector.shape_cast %4 : vector<1x16x64xbf16> to vector<16x64xbf16>
    %6 = vector.extract_strided_slice %1 {offsets = [0, 0], sizes = [2, 16], strides = [1, 1]} : vector<3x16xbf16> to vector<2x16xbf16>
    %cst = arith.constant dense<0.000000e+00> : vector<2x64xf32>
    %7 = tpu.matmul %6, %3, %cst {dimension_numbers = #tpu.dot_dimension_numbers<[1], [0], [0], [1], [0, 0, 1, 1], [], []>} : vector<2x16xbf16>, vector<16x64xbf16>, vector<2x64xf32> -> vector<2x64xf32>
    %8 = vector.extract_strided_slice %1 {offsets = [1, 0], sizes = [2, 16], strides = [1, 1]} : vector<3x16xbf16> to vector<2x16xbf16>
    %cst_8 = arith.constant dense<0.000000e+00> : vector<2x64xf32>
    %9 = tpu.matmul %8, %5, %cst_8 {dimension_numbers = #tpu.dot_dimension_numbers<[1], [0], [0], [1], [0, 0, 1, 1], [], []>} : vector<2x16xbf16>, vector<16x64xbf16>, vector<2x64xf32> -> vector<2x64xf32>
    %10 = arith.addf %7, %9 : vector<2x64xf32>
    %c0_9 = arith.constant 0 : index
    %c0_10 = arith.constant 0 : index
    %c0_11 = arith.constant 0 : index
    %11 = vector.load %arg5[%c0_9, %c0_10, %c0_11] : memref<1x1x64xf32, #tpu.memory_space<vmem>>, vector<1x1x64xf32>
    %12 = vector.shape_cast %11 : vector<1x1x64xf32> to vector<1x64xf32>
    %13 = vector.broadcast %12 : vector<1x64xf32> to vector<2x64xf32>
    %14 = arith.addf %10, %13 : vector<2x64xf32>
    %cst_12 = arith.constant 0.000000e+00 : f32
    %15 = vector.broadcast %cst_12 : f32 to vector<2x64xf32>
    %16 = arith.cmpf oge, %14, %15 : vector<2x64xf32>
    %cst_13 = arith.constant 0.00999999977 : f32
    %17 = vector.broadcast %cst_13 : f32 to vector<2x64xf32>
    %18 = arith.mulf %17, %14 : vector<2x64xf32>
    %19 = arith.select %16, %14, %18 : vector<2x64xi1>, vector<2x64xf32>
    %cst_14 = arith.constant 0.000000e+00 : f32
    %20 = vector.broadcast %cst_14 : f32 to vector<1x64xf32>
    %21 = tpu.concatenate %19, %20 in 0 : vector<2x64xf32>, vector<1x64xf32> -> vector<3x64xf32>
    %22 = arith.truncf %21 : vector<3x64xf32> to vector<3x64xbf16>
    %c0_15 = arith.constant 0 : index
    %c0_16 = arith.constant 0 : index
    %c0_17 = arith.constant 0 : index
    %c0_18 = arith.constant 0 : index
    %23 = vector.load %arg6[%c0_15, %c0_16, %c0_17, %c0_18] : memref<1x1x3x64xbf16, #tpu.memory_space<vmem>>, vector<1x1x3x64xbf16>
    %24 = vector.shape_cast %23 : vector<1x1x3x64xbf16> to vector<3x64xbf16>
    %25 = vector.shape_cast %22 : vector<3x64xbf16> to vector<1x1x3x64xbf16>
    tpu.vector_store %arg6[%c0_15, %c0_16, %c0_17, %c0_18], %25 {strides = array<i32>} : memref<1x1x3x64xbf16, #tpu.memory_space<vmem>>, vector<1x1x3x64xbf16>,
    return
  }
  func.func @transform_0(%arg0: i32, %arg1: i32) -> (i32, i32, i32) {
    %c0_i32 = arith.constant 0 : i32
    %c0_i32_0 = arith.constant 0 : i32
    %c0_i32_1 = arith.constant 0 : i32
    return %arg1, %c0_i32, %c0_i32_0 : i32, i32, i32
  }
  func.func @transform_1(%arg0: i32, %arg1: i32) -> (i32, i32, i32) {
    %c0_i32 = arith.constant 0 : i32
    %c0_i32_0 = arith.constant 0 : i32
    %c0_i32_1 = arith.constant 0 : i32
    return %arg0, %c0_i32, %c0_i32_0 : i32, i32, i32
  }
  func.func @transform_2(%arg0: i32, %arg1: i32) -> (i32, i32, i32) {
    %c0_i32 = arith.constant 0 : i32
    %c0_i32_0 = arith.constant 0 : i32
    %c0_i32_1 = arith.constant 0 : i32
    return %arg0, %c0_i32, %c0_i32_0 : i32, i32, i32
  }
  func.func @transform_3(%arg0: i32, %arg1: i32) -> (i32, i32, i32) {
    %c0_i32 = arith.constant 0 : i32
    %c0_i32_0 = arith.constant 0 : i32
    %c0_i32_1 = arith.constant 0 : i32
    return %arg0, %c0_i32, %c0_i32_0 : i32, i32, i32
  }
  func.func @transform_4(%arg0: i32, %arg1: i32) -> (i32, i32, i32, i32) {
    %c0_i32 = arith.constant 0 : i32
    %c0_i32_0 = arith.constant 0 : i32
    %c0_i32_1 = arith.constant 0 : i32
    return %arg0, %arg1, %c0_i32, %c0_i32_0 : i32, i32, i32, i32
  }
}

module attributes {stable_mosaic.version = 11 : i64} {
  func.func @_enc_conv_kernel(%arg0: i32, %arg1: memref<1x7x2xbf16, #tpu.memory_space<vmem>>, %arg2: memref<2x16xbf16, #tpu.memory_space<vmem>>, %arg3: memref<2x16xbf16, #tpu.memory_space<vmem>>, %arg4: memref<1x16xf32, #tpu.memory_space<vmem>>, %arg5: memref<1x9x16xbf16, #tpu.memory_space<vmem>>) attributes {dimension_semantics = [#tpu.dimension_semantics<parallel>], iteration_bounds = array<i64: 2>, scalar_prefetch = 0 : i64, scratch_operands = 0 : i64, tpu.core_type = #tpu.core_type<tc>, window_params = [{transform_indices = @transform_0, window_bounds = array<i64: 1, 7, 2>}, {pipeline_mode = #tpu.pipeline_mode<synchronous>, transform_indices = @transform_1, window_bounds = array<i64: 2, 16>}, {pipeline_mode = #tpu.pipeline_mode<synchronous>, transform_indices = @transform_2, window_bounds = array<i64: 2, 16>}, {pipeline_mode = #tpu.pipeline_mode<synchronous>, transform_indices = @transform_3, window_bounds = array<i64: 1, 16>}, {transform_indices = @transform_4, window_bounds = array<i64: 1, 9, 16>}]} {
    %c0 = arith.constant 0 : index
    %c0_0 = arith.constant 0 : index
    %c0_1 = arith.constant 0 : index
    %0 = vector.load %arg1[%c0, %c0_0, %c0_1] : memref<1x7x2xbf16, #tpu.memory_space<vmem>>, vector<1x7x2xbf16>
    %1 = vector.shape_cast %0 : vector<1x7x2xbf16> to vector<7x2xbf16>
    %2 = vector.extract_strided_slice %1 {offsets = [0, 0], sizes = [6, 2], strides = [1, 1]} : vector<7x2xbf16> to vector<6x2xbf16>
    %c0_2 = arith.constant 0 : index
    %c0_3 = arith.constant 0 : index
    %3 = vector.load %arg2[%c0_2, %c0_3] : memref<2x16xbf16, #tpu.memory_space<vmem>>, vector<2x16xbf16>
    %cst = arith.constant dense<0.000000e+00> : vector<6x16xf32>
    %4 = tpu.matmul %2, %3, %cst {dimension_numbers = #tpu.dot_dimension_numbers<[1], [0], [0], [1], [0, 0, 1, 1], [], []>} : vector<6x2xbf16>, vector<2x16xbf16>, vector<6x16xf32> -> vector<6x16xf32>
    %5 = vector.extract_strided_slice %1 {offsets = [1, 0], sizes = [6, 2], strides = [1, 1]} : vector<7x2xbf16> to vector<6x2xbf16>
    %c0_4 = arith.constant 0 : index
    %c0_5 = arith.constant 0 : index
    %6 = vector.load %arg3[%c0_4, %c0_5] : memref<2x16xbf16, #tpu.memory_space<vmem>>, vector<2x16xbf16>
    %cst_6 = arith.constant dense<0.000000e+00> : vector<6x16xf32>
    %7 = tpu.matmul %5, %6, %cst_6 {dimension_numbers = #tpu.dot_dimension_numbers<[1], [0], [0], [1], [0, 0, 1, 1], [], []>} : vector<6x2xbf16>, vector<2x16xbf16>, vector<6x16xf32> -> vector<6x16xf32>
    %8 = arith.addf %4, %7 : vector<6x16xf32>
    %c0_7 = arith.constant 0 : index
    %c0_8 = arith.constant 0 : index
    %9 = vector.load %arg4[%c0_7, %c0_8] : memref<1x16xf32, #tpu.memory_space<vmem>>, vector<1x16xf32>
    %10 = vector.broadcast %9 : vector<1x16xf32> to vector<6x16xf32>
    %11 = arith.addf %8, %10 : vector<6x16xf32>
    %cst_9 = arith.constant 0.000000e+00 : f32
    %12 = vector.broadcast %cst_9 : f32 to vector<6x16xf32>
    %13 = arith.cmpf oge, %11, %12 : vector<6x16xf32>
    %cst_10 = arith.constant 0.00999999977 : f32
    %14 = vector.broadcast %cst_10 : f32 to vector<6x16xf32>
    %15 = arith.mulf %14, %11 : vector<6x16xf32>
    %16 = arith.select %13, %11, %15 : vector<6x16xi1>, vector<6x16xf32>
    %cst_11 = arith.constant 0.000000e+00 : f32
    %17 = vector.broadcast %cst_11 : f32 to vector<3x16xf32>
    %18 = tpu.concatenate %16, %17 in 0 : vector<6x16xf32>, vector<3x16xf32> -> vector<9x16xf32>
    %19 = arith.truncf %18 : vector<9x16xf32> to vector<9x16xbf16>
    %c0_12 = arith.constant 0 : index
    %c0_13 = arith.constant 0 : index
    %c0_14 = arith.constant 0 : index
    %20 = vector.load %arg5[%c0_12, %c0_13, %c0_14] : memref<1x9x16xbf16, #tpu.memory_space<vmem>>, vector<1x9x16xbf16>
    %21 = vector.shape_cast %20 : vector<1x9x16xbf16> to vector<9x16xbf16>
    %22 = vector.shape_cast %19 : vector<9x16xbf16> to vector<1x9x16xbf16>
    tpu.vector_store %arg5[%c0_12, %c0_13, %c0_14], %22 {strides = array<i32>} : memref<1x9x16xbf16, #tpu.memory_space<vmem>>, vector<1x9x16xbf16>,
    return
  }
  func.func @transform_0(%arg0: i32) -> (i32, i32, i32) {
    %c0_i32 = arith.constant 0 : i32
    %c0_i32_0 = arith.constant 0 : i32
    %c0_i32_1 = arith.constant 0 : i32
    return %arg0, %c0_i32, %c0_i32_0 : i32, i32, i32
  }
  func.func @transform_1(%arg0: i32) -> (i32, i32) {
    %c0_i32 = arith.constant 0 : i32
    %c0_i32_0 = arith.constant 0 : i32
    %c0_i32_1 = arith.constant 0 : i32
    return %c0_i32, %c0_i32_0 : i32, i32
  }
  func.func @transform_2(%arg0: i32) -> (i32, i32) {
    %c0_i32 = arith.constant 0 : i32
    %c0_i32_0 = arith.constant 0 : i32
    %c0_i32_1 = arith.constant 0 : i32
    return %c0_i32, %c0_i32_0 : i32, i32
  }
  func.func @transform_3(%arg0: i32) -> (i32, i32) {
    %c0_i32 = arith.constant 0 : i32
    %c0_i32_0 = arith.constant 0 : i32
    %c0_i32_1 = arith.constant 0 : i32
    return %c0_i32, %c0_i32_0 : i32, i32
  }
  func.func @transform_4(%arg0: i32) -> (i32, i32, i32) {
    %c0_i32 = arith.constant 0 : i32
    %c0_i32_0 = arith.constant 0 : i32
    %c0_i32_1 = arith.constant 0 : i32
    return %arg0, %c0_i32, %c0_i32_0 : i32, i32, i32
  }
}

module attributes {stable_mosaic.version = 11 : i64} {
  func.func @_enc_conv_kernel(%arg0: i32, %arg1: memref<1x5x32xbf16, #tpu.memory_space<vmem>>, %arg2: memref<32x32xbf16, #tpu.memory_space<vmem>>, %arg3: memref<32x32xbf16, #tpu.memory_space<vmem>>, %arg4: memref<1x32xf32, #tpu.memory_space<vmem>>, %arg5: memref<1x5x32xbf16, #tpu.memory_space<vmem>>) attributes {dimension_semantics = [#tpu.dimension_semantics<parallel>], iteration_bounds = array<i64: 2>, scalar_prefetch = 0 : i64, scratch_operands = 0 : i64, tpu.core_type = #tpu.core_type<tc>, window_params = [{transform_indices = @transform_0, window_bounds = array<i64: 1, 5, 32>}, {pipeline_mode = #tpu.pipeline_mode<synchronous>, transform_indices = @transform_1, window_bounds = array<i64: 32, 32>}, {pipeline_mode = #tpu.pipeline_mode<synchronous>, transform_indices = @transform_2, window_bounds = array<i64: 32, 32>}, {pipeline_mode = #tpu.pipeline_mode<synchronous>, transform_indices = @transform_3, window_bounds = array<i64: 1, 32>}, {transform_indices = @transform_4, window_bounds = array<i64: 1, 5, 32>}]} {
    %c0 = arith.constant 0 : index
    %c0_0 = arith.constant 0 : index
    %c0_1 = arith.constant 0 : index
    %0 = vector.load %arg1[%c0, %c0_0, %c0_1] : memref<1x5x32xbf16, #tpu.memory_space<vmem>>, vector<1x5x32xbf16>
    %1 = vector.shape_cast %0 : vector<1x5x32xbf16> to vector<5x32xbf16>
    %2 = vector.extract_strided_slice %1 {offsets = [0, 0], sizes = [3, 32], strides = [1, 1]} : vector<5x32xbf16> to vector<3x32xbf16>
    %c0_2 = arith.constant 0 : index
    %c0_3 = arith.constant 0 : index
    %3 = vector.load %arg2[%c0_2, %c0_3] : memref<32x32xbf16, #tpu.memory_space<vmem>>, vector<32x32xbf16>
    %cst = arith.constant dense<0.000000e+00> : vector<3x32xf32>
    %4 = tpu.matmul %2, %3, %cst {dimension_numbers = #tpu.dot_dimension_numbers<[1], [0], [0], [1], [0, 0, 1, 1], [], []>} : vector<3x32xbf16>, vector<32x32xbf16>, vector<3x32xf32> -> vector<3x32xf32>
    %5 = vector.extract_strided_slice %1 {offsets = [1, 0], sizes = [3, 32], strides = [1, 1]} : vector<5x32xbf16> to vector<3x32xbf16>
    %c0_4 = arith.constant 0 : index
    %c0_5 = arith.constant 0 : index
    %6 = vector.load %arg3[%c0_4, %c0_5] : memref<32x32xbf16, #tpu.memory_space<vmem>>, vector<32x32xbf16>
    %cst_6 = arith.constant dense<0.000000e+00> : vector<3x32xf32>
    %7 = tpu.matmul %5, %6, %cst_6 {dimension_numbers = #tpu.dot_dimension_numbers<[1], [0], [0], [1], [0, 0, 1, 1], [], []>} : vector<3x32xbf16>, vector<32x32xbf16>, vector<3x32xf32> -> vector<3x32xf32>
    %8 = arith.addf %4, %7 : vector<3x32xf32>
    %c0_7 = arith.constant 0 : index
    %c0_8 = arith.constant 0 : index
    %9 = vector.load %arg4[%c0_7, %c0_8] : memref<1x32xf32, #tpu.memory_space<vmem>>, vector<1x32xf32>
    %10 = vector.broadcast %9 : vector<1x32xf32> to vector<3x32xf32>
    %11 = arith.addf %8, %10 : vector<3x32xf32>
    %cst_9 = arith.constant 0.000000e+00 : f32
    %12 = vector.broadcast %cst_9 : f32 to vector<3x32xf32>
    %13 = arith.cmpf oge, %11, %12 : vector<3x32xf32>
    %cst_10 = arith.constant 0.00999999977 : f32
    %14 = vector.broadcast %cst_10 : f32 to vector<3x32xf32>
    %15 = arith.mulf %14, %11 : vector<3x32xf32>
    %16 = arith.select %13, %11, %15 : vector<3x32xi1>, vector<3x32xf32>
    %cst_11 = arith.constant 0.000000e+00 : f32
    %17 = vector.broadcast %cst_11 : f32 to vector<2x32xf32>
    %18 = tpu.concatenate %16, %17 in 0 : vector<3x32xf32>, vector<2x32xf32> -> vector<5x32xf32>
    %19 = arith.truncf %18 : vector<5x32xf32> to vector<5x32xbf16>
    %c0_12 = arith.constant 0 : index
    %c0_13 = arith.constant 0 : index
    %c0_14 = arith.constant 0 : index
    %20 = vector.load %arg5[%c0_12, %c0_13, %c0_14] : memref<1x5x32xbf16, #tpu.memory_space<vmem>>, vector<1x5x32xbf16>
    %21 = vector.shape_cast %20 : vector<1x5x32xbf16> to vector<5x32xbf16>
    %22 = vector.shape_cast %19 : vector<5x32xbf16> to vector<1x5x32xbf16>
    tpu.vector_store %arg5[%c0_12, %c0_13, %c0_14], %22 {strides = array<i32>} : memref<1x5x32xbf16, #tpu.memory_space<vmem>>, vector<1x5x32xbf16>,
    return
  }
  func.func @transform_0(%arg0: i32) -> (i32, i32, i32) {
    %c0_i32 = arith.constant 0 : i32
    %c0_i32_0 = arith.constant 0 : i32
    %c0_i32_1 = arith.constant 0 : i32
    return %arg0, %c0_i32, %c0_i32_0 : i32, i32, i32
  }
  func.func @transform_1(%arg0: i32) -> (i32, i32) {
    %c0_i32 = arith.constant 0 : i32
    %c0_i32_0 = arith.constant 0 : i32
    %c0_i32_1 = arith.constant 0 : i32
    return %c0_i32, %c0_i32_0 : i32, i32
  }
  func.func @transform_2(%arg0: i32) -> (i32, i32) {
    %c0_i32 = arith.constant 0 : i32
    %c0_i32_0 = arith.constant 0 : i32
    %c0_i32_1 = arith.constant 0 : i32
    return %c0_i32, %c0_i32_0 : i32, i32
  }
  func.func @transform_3(%arg0: i32) -> (i32, i32) {
    %c0_i32 = arith.constant 0 : i32
    %c0_i32_0 = arith.constant 0 : i32
    %c0_i32_1 = arith.constant 0 : i32
    return %c0_i32, %c0_i32_0 : i32, i32
  }
  func.func @transform_4(%arg0: i32) -> (i32, i32, i32) {
    %c0_i32 = arith.constant 0 : i32
    %c0_i32_0 = arith.constant 0 : i32
    %c0_i32_1 = arith.constant 0 : i32
    return %arg0, %c0_i32, %c0_i32_0 : i32, i32, i32
  }
}

module attributes {stable_mosaic.version = 11 : i64} {
  func.func @_enc_conv_kernel(%arg0: i32, %arg1: memref<1x3x64xbf16, #tpu.memory_space<vmem>>, %arg2: memref<64x16xbf16, #tpu.memory_space<vmem>>, %arg3: memref<64x16xbf16, #tpu.memory_space<vmem>>, %arg4: memref<1x16xf32, #tpu.memory_space<vmem>>, %arg5: memref<1x3x16xbf16, #tpu.memory_space<vmem>>) attributes {dimension_semantics = [#tpu.dimension_semantics<parallel>], iteration_bounds = array<i64: 2>, scalar_prefetch = 0 : i64, scratch_operands = 0 : i64, tpu.core_type = #tpu.core_type<tc>, window_params = [{transform_indices = @transform_0, window_bounds = array<i64: 1, 3, 64>}, {pipeline_mode = #tpu.pipeline_mode<synchronous>, transform_indices = @transform_1, window_bounds = array<i64: 64, 16>}, {pipeline_mode = #tpu.pipeline_mode<synchronous>, transform_indices = @transform_2, window_bounds = array<i64: 64, 16>}, {pipeline_mode = #tpu.pipeline_mode<synchronous>, transform_indices = @transform_3, window_bounds = array<i64: 1, 16>}, {transform_indices = @transform_4, window_bounds = array<i64: 1, 3, 16>}]} {
    %c0 = arith.constant 0 : index
    %c0_0 = arith.constant 0 : index
    %c0_1 = arith.constant 0 : index
    %0 = vector.load %arg1[%c0, %c0_0, %c0_1] : memref<1x3x64xbf16, #tpu.memory_space<vmem>>, vector<1x3x64xbf16>
    %1 = vector.shape_cast %0 : vector<1x3x64xbf16> to vector<3x64xbf16>
    %2 = vector.extract_strided_slice %1 {offsets = [0, 0], sizes = [2, 64], strides = [1, 1]} : vector<3x64xbf16> to vector<2x64xbf16>
    %c0_2 = arith.constant 0 : index
    %c0_3 = arith.constant 0 : index
    %3 = vector.load %arg2[%c0_2, %c0_3] : memref<64x16xbf16, #tpu.memory_space<vmem>>, vector<64x16xbf16>
    %cst = arith.constant dense<0.000000e+00> : vector<2x16xf32>
    %4 = tpu.matmul %2, %3, %cst {dimension_numbers = #tpu.dot_dimension_numbers<[1], [0], [0], [1], [0, 0, 1, 1], [], []>} : vector<2x64xbf16>, vector<64x16xbf16>, vector<2x16xf32> -> vector<2x16xf32>
    %5 = vector.extract_strided_slice %1 {offsets = [1, 0], sizes = [2, 64], strides = [1, 1]} : vector<3x64xbf16> to vector<2x64xbf16>
    %c0_4 = arith.constant 0 : index
    %c0_5 = arith.constant 0 : index
    %6 = vector.load %arg3[%c0_4, %c0_5] : memref<64x16xbf16, #tpu.memory_space<vmem>>, vector<64x16xbf16>
    %cst_6 = arith.constant dense<0.000000e+00> : vector<2x16xf32>
    %7 = tpu.matmul %5, %6, %cst_6 {dimension_numbers = #tpu.dot_dimension_numbers<[1], [0], [0], [1], [0, 0, 1, 1], [], []>} : vector<2x64xbf16>, vector<64x16xbf16>, vector<2x16xf32> -> vector<2x16xf32>
    %8 = arith.addf %4, %7 : vector<2x16xf32>
    %c0_7 = arith.constant 0 : index
    %c0_8 = arith.constant 0 : index
    %9 = vector.load %arg4[%c0_7, %c0_8] : memref<1x16xf32, #tpu.memory_space<vmem>>, vector<1x16xf32>
    %10 = vector.broadcast %9 : vector<1x16xf32> to vector<2x16xf32>
    %11 = arith.addf %8, %10 : vector<2x16xf32>
    %cst_9 = arith.constant 0.000000e+00 : f32
    %12 = vector.broadcast %cst_9 : f32 to vector<2x16xf32>
    %13 = arith.cmpf oge, %11, %12 : vector<2x16xf32>
    %cst_10 = arith.constant 0.00999999977 : f32
    %14 = vector.broadcast %cst_10 : f32 to vector<2x16xf32>
    %15 = arith.mulf %14, %11 : vector<2x16xf32>
    %16 = arith.select %13, %11, %15 : vector<2x16xi1>, vector<2x16xf32>
    %cst_11 = arith.constant 0.000000e+00 : f32
    %17 = vector.broadcast %cst_11 : f32 to vector<1x16xf32>
    %18 = tpu.concatenate %16, %17 in 0 : vector<2x16xf32>, vector<1x16xf32> -> vector<3x16xf32>
    %19 = arith.truncf %18 : vector<3x16xf32> to vector<3x16xbf16>
    %c0_12 = arith.constant 0 : index
    %c0_13 = arith.constant 0 : index
    %c0_14 = arith.constant 0 : index
    %20 = vector.load %arg5[%c0_12, %c0_13, %c0_14] : memref<1x3x16xbf16, #tpu.memory_space<vmem>>, vector<1x3x16xbf16>
    %21 = vector.shape_cast %20 : vector<1x3x16xbf16> to vector<3x16xbf16>
    %22 = vector.shape_cast %19 : vector<3x16xbf16> to vector<1x3x16xbf16>
    tpu.vector_store %arg5[%c0_12, %c0_13, %c0_14], %22 {strides = array<i32>} : memref<1x3x16xbf16, #tpu.memory_space<vmem>>, vector<1x3x16xbf16>,
    return
  }
  func.func @transform_0(%arg0: i32) -> (i32, i32, i32) {
    %c0_i32 = arith.constant 0 : i32
    %c0_i32_0 = arith.constant 0 : i32
    %c0_i32_1 = arith.constant 0 : i32
    return %arg0, %c0_i32, %c0_i32_0 : i32, i32, i32
  }
  func.func @transform_1(%arg0: i32) -> (i32, i32) {
    %c0_i32 = arith.constant 0 : i32
    %c0_i32_0 = arith.constant 0 : i32
    %c0_i32_1 = arith.constant 0 : i32
    return %c0_i32, %c0_i32_0 : i32, i32
  }
  func.func @transform_2(%arg0: i32) -> (i32, i32) {
    %c0_i32 = arith.constant 0 : i32
    %c0_i32_0 = arith.constant 0 : i32
    %c0_i32_1 = arith.constant 0 : i32
    return %c0_i32, %c0_i32_0 : i32, i32
  }
  func.func @transform_3(%arg0: i32) -> (i32, i32) {
    %c0_i32 = arith.constant 0 : i32
    %c0_i32_0 = arith.constant 0 : i32
    %c0_i32_1 = arith.constant 0 : i32
    return %c0_i32, %c0_i32_0 : i32, i32
  }
  func.func @transform_4(%arg0: i32) -> (i32, i32, i32) {
    %c0_i32 = arith.constant 0 : i32
    %c0_i32_0 = arith.constant 0 : i32
    %c0_i32_1 = arith.constant 0 : i32
    return %arg0, %c0_i32, %c0_i32_0 : i32, i32, i32
  }
}

module attributes {stable_mosaic.version = 11 : i64} {
  func.func @_dec_convT_kernel(%arg0: i32, %arg1: i32, %arg2: memref<1x1x6x32xbf16, #tpu.memory_space<vmem>>, %arg3: memref<1x5x32xbf16, #tpu.memory_space<vmem>>, %arg4: memref<1x32x32xbf16, #tpu.memory_space<vmem>>, %arg5: memref<1x32x32xbf16, #tpu.memory_space<vmem>>, %arg6: memref<1x32x32xbf16, #tpu.memory_space<vmem>>, %arg7: memref<1x32x32xbf16, #tpu.memory_space<vmem>>, %arg8: memref<1x1x32xf32, #tpu.memory_space<vmem>>, %arg9: memref<1x1x5x32xbf16, #tpu.memory_space<vmem>>) attributes {dimension_semantics = [#tpu.dimension_semantics<parallel>, #tpu.dimension_semantics<parallel>], iteration_bounds = array<i64: 2, 2>, scalar_prefetch = 0 : i64, scratch_operands = 0 : i64, tpu.core_type = #tpu.core_type<tc>, window_params = [{transform_indices = @transform_0, window_bounds = array<i64: 1, 1, 6, 32>}, {transform_indices = @transform_1, window_bounds = array<i64: 1, 5, 32>}, {transform_indices = @transform_2, window_bounds = array<i64: 1, 32, 32>}, {transform_indices = @transform_3, window_bounds = array<i64: 1, 32, 32>}, {transform_indices = @transform_4, window_bounds = array<i64: 1, 32, 32>}, {transform_indices = @transform_5, window_bounds = array<i64: 1, 32, 32>}, {transform_indices = @transform_6, window_bounds = array<i64: 1, 1, 32>}, {transform_indices = @transform_7, window_bounds = array<i64: 1, 1, 5, 32>}]} {
    %c0 = arith.constant 0 : index
    %c0_0 = arith.constant 0 : index
    %c0_1 = arith.constant 0 : index
    %c0_2 = arith.constant 0 : index
    %0 = vector.load %arg2[%c0, %c0_0, %c0_1, %c0_2] : memref<1x1x6x32xbf16, #tpu.memory_space<vmem>>, vector<1x1x6x32xbf16>
    %1 = vector.shape_cast %0 : vector<1x1x6x32xbf16> to vector<6x32xbf16>
    %c0_3 = arith.constant 0 : index
    %c0_4 = arith.constant 0 : index
    %c0_5 = arith.constant 0 : index
    %2 = vector.load %arg4[%c0_3, %c0_4, %c0_5] : memref<1x32x32xbf16, #tpu.memory_space<vmem>>, vector<1x32x32xbf16>
    %3 = vector.shape_cast %2 : vector<1x32x32xbf16> to vector<32x32xbf16>
    %c0_6 = arith.constant 0 : index
    %c0_7 = arith.constant 0 : index
    %c0_8 = arith.constant 0 : index
    %4 = vector.load %arg5[%c0_6, %c0_7, %c0_8] : memref<1x32x32xbf16, #tpu.memory_space<vmem>>, vector<1x32x32xbf16>
    %5 = vector.shape_cast %4 : vector<1x32x32xbf16> to vector<32x32xbf16>
    %6 = vector.extract_strided_slice %1 {offsets = [0, 0], sizes = [4, 32], strides = [1, 1]} : vector<6x32xbf16> to vector<4x32xbf16>
    %cst = arith.constant dense<0.000000e+00> : vector<4x32xf32>
    %7 = tpu.matmul %6, %3, %cst {dimension_numbers = #tpu.dot_dimension_numbers<[1], [0], [0], [1], [0, 0, 1, 1], [], []>} : vector<4x32xbf16>, vector<32x32xbf16>, vector<4x32xf32> -> vector<4x32xf32>
    %8 = vector.extract_strided_slice %1 {offsets = [1, 0], sizes = [4, 32], strides = [1, 1]} : vector<6x32xbf16> to vector<4x32xbf16>
    %cst_9 = arith.constant dense<0.000000e+00> : vector<4x32xf32>
    %9 = tpu.matmul %8, %5, %cst_9 {dimension_numbers = #tpu.dot_dimension_numbers<[1], [0], [0], [1], [0, 0, 1, 1], [], []>} : vector<4x32xbf16>, vector<32x32xbf16>, vector<4x32xf32> -> vector<4x32xf32>
    %10 = arith.addf %7, %9 : vector<4x32xf32>
    %c0_10 = arith.constant 0 : index
    %c0_11 = arith.constant 0 : index
    %c0_12 = arith.constant 0 : index
    %11 = vector.load %arg3[%c0_10, %c0_11, %c0_12] : memref<1x5x32xbf16, #tpu.memory_space<vmem>>, vector<1x5x32xbf16>
    %12 = vector.shape_cast %11 : vector<1x5x32xbf16> to vector<5x32xbf16>
    %c0_13 = arith.constant 0 : index
    %c0_14 = arith.constant 0 : index
    %c0_15 = arith.constant 0 : index
    %13 = vector.load %arg6[%c0_13, %c0_14, %c0_15] : memref<1x32x32xbf16, #tpu.memory_space<vmem>>, vector<1x32x32xbf16>
    %14 = vector.shape_cast %13 : vector<1x32x32xbf16> to vector<32x32xbf16>
    %c0_16 = arith.constant 0 : index
    %c0_17 = arith.constant 0 : index
    %c0_18 = arith.constant 0 : index
    %15 = vector.load %arg7[%c0_16, %c0_17, %c0_18] : memref<1x32x32xbf16, #tpu.memory_space<vmem>>, vector<1x32x32xbf16>
    %16 = vector.shape_cast %15 : vector<1x32x32xbf16> to vector<32x32xbf16>
    %17 = vector.extract_strided_slice %12 {offsets = [0, 0], sizes = [4, 32], strides = [1, 1]} : vector<5x32xbf16> to vector<4x32xbf16>
    %cst_19 = arith.constant dense<0.000000e+00> : vector<4x32xf32>
    %18 = tpu.matmul %17, %14, %cst_19 {dimension_numbers = #tpu.dot_dimension_numbers<[1], [0], [0], [1], [0, 0, 1, 1], [], []>} : vector<4x32xbf16>, vector<32x32xbf16>, vector<4x32xf32> -> vector<4x32xf32>
    %19 = vector.extract_strided_slice %12 {offsets = [1, 0], sizes = [4, 32], strides = [1, 1]} : vector<5x32xbf16> to vector<4x32xbf16>
    %cst_20 = arith.constant dense<0.000000e+00> : vector<4x32xf32>
    %20 = tpu.matmul %19, %16, %cst_20 {dimension_numbers = #tpu.dot_dimension_numbers<[1], [0], [0], [1], [0, 0, 1, 1], [], []>} : vector<4x32xbf16>, vector<32x32xbf16>, vector<4x32xf32> -> vector<4x32xf32>
    %21 = arith.addf %18, %20 : vector<4x32xf32>
    %22 = arith.addf %10, %21 : vector<4x32xf32>
    %c0_21 = arith.constant 0 : index
    %c0_22 = arith.constant 0 : index
    %c0_23 = arith.constant 0 : index
    %23 = vector.load %arg8[%c0_21, %c0_22, %c0_23] : memref<1x1x32xf32, #tpu.memory_space<vmem>>, vector<1x1x32xf32>
    %24 = vector.shape_cast %23 : vector<1x1x32xf32> to vector<1x32xf32>
    %25 = vector.broadcast %24 : vector<1x32xf32> to vector<4x32xf32>
    %26 = arith.addf %22, %25 : vector<4x32xf32>
    %cst_24 = arith.constant 0.000000e+00 : f32
    %27 = vector.broadcast %cst_24 : f32 to vector<4x32xf32>
    %28 = arith.cmpf oge, %26, %27 : vector<4x32xf32>
    %cst_25 = arith.constant 0.00999999977 : f32
    %29 = vector.broadcast %cst_25 : f32 to vector<4x32xf32>
    %30 = arith.mulf %29, %26 : vector<4x32xf32>
    %31 = arith.select %28, %26, %30 : vector<4x32xi1>, vector<4x32xf32>
    %cst_26 = arith.constant 0.000000e+00 : f32
    %32 = vector.broadcast %cst_26 : f32 to vector<1x32xf32>
    %33 = tpu.concatenate %31, %32 in 0 : vector<4x32xf32>, vector<1x32xf32> -> vector<5x32xf32>
    %34 = arith.truncf %33 : vector<5x32xf32> to vector<5x32xbf16>
    %c0_27 = arith.constant 0 : index
    %c0_28 = arith.constant 0 : index
    %c0_29 = arith.constant 0 : index
    %c0_30 = arith.constant 0 : index
    %35 = vector.load %arg9[%c0_27, %c0_28, %c0_29, %c0_30] : memref<1x1x5x32xbf16, #tpu.memory_space<vmem>>, vector<1x1x5x32xbf16>
    %36 = vector.shape_cast %35 : vector<1x1x5x32xbf16> to vector<5x32xbf16>
    %37 = vector.shape_cast %34 : vector<5x32xbf16> to vector<1x1x5x32xbf16>
    tpu.vector_store %arg9[%c0_27, %c0_28, %c0_29, %c0_30], %37 {strides = array<i32>} : memref<1x1x5x32xbf16, #tpu.memory_space<vmem>>, vector<1x1x5x32xbf16>,
    return
  }
  func.func @transform_0(%arg0: i32, %arg1: i32) -> (i32, i32, i32, i32) {
    %c0_i32 = arith.constant 0 : i32
    %c0_i32_0 = arith.constant 0 : i32
    %c0_i32_1 = arith.constant 0 : i32
    return %arg0, %arg1, %c0_i32, %c0_i32_0 : i32, i32, i32, i32
  }
  func.func @transform_1(%arg0: i32, %arg1: i32) -> (i32, i32, i32) {
    %c0_i32 = arith.constant 0 : i32
    %c0_i32_0 = arith.constant 0 : i32
    %c0_i32_1 = arith.constant 0 : i32
    return %arg1, %c0_i32, %c0_i32_0 : i32, i32, i32
  }
  func.func @transform_2(%arg0: i32, %arg1: i32) -> (i32, i32, i32) {
    %c0_i32 = arith.constant 0 : i32
    %c0_i32_0 = arith.constant 0 : i32
    %c0_i32_1 = arith.constant 0 : i32
    return %arg0, %c0_i32, %c0_i32_0 : i32, i32, i32
  }
  func.func @transform_3(%arg0: i32, %arg1: i32) -> (i32, i32, i32) {
    %c0_i32 = arith.constant 0 : i32
    %c0_i32_0 = arith.constant 0 : i32
    %c0_i32_1 = arith.constant 0 : i32
    return %arg0, %c0_i32, %c0_i32_0 : i32, i32, i32
  }
  func.func @transform_4(%arg0: i32, %arg1: i32) -> (i32, i32, i32) {
    %c0_i32 = arith.constant 0 : i32
    %c0_i32_0 = arith.constant 0 : i32
    %c0_i32_1 = arith.constant 0 : i32
    return %arg0, %c0_i32, %c0_i32_0 : i32, i32, i32
  }
  func.func @transform_5(%arg0: i32, %arg1: i32) -> (i32, i32, i32) {
    %c0_i32 = arith.constant 0 : i32
    %c0_i32_0 = arith.constant 0 : i32
    %c0_i32_1 = arith.constant 0 : i32
    return %arg0, %c0_i32, %c0_i32_0 : i32, i32, i32
  }
  func.func @transform_6(%arg0: i32, %arg1: i32) -> (i32, i32, i32) {
    %c0_i32 = arith.constant 0 : i32
    %c0_i32_0 = arith.constant 0 : i32
    %c0_i32_1 = arith.constant 0 : i32
    return %arg0, %c0_i32, %c0_i32_0 : i32, i32, i32
  }
  func.func @transform_7(%arg0: i32, %arg1: i32) -> (i32, i32, i32, i32) {
    %c0_i32 = arith.constant 0 : i32
    %c0_i32_0 = arith.constant 0 : i32
    %c0_i32_1 = arith.constant 0 : i32
    return %arg0, %arg1, %c0_i32, %c0_i32_0 : i32, i32, i32, i32
  }
}

module attributes {stable_mosaic.version = 11 : i64} {
  func.func @_dec_convT_kernel(%arg0: i32, %arg1: i32, %arg2: memref<1x1x10x16xbf16, #tpu.memory_space<vmem>>, %arg3: memref<1x9x16xbf16, #tpu.memory_space<vmem>>, %arg4: memref<1x16x2xbf16, #tpu.memory_space<vmem>>, %arg5: memref<1x16x2xbf16, #tpu.memory_space<vmem>>, %arg6: memref<1x16x2xbf16, #tpu.memory_space<vmem>>, %arg7: memref<1x16x2xbf16, #tpu.memory_space<vmem>>, %arg8: memref<1x1x2xf32, #tpu.memory_space<vmem>>, %arg9: memref<1x1x8x2xf32, #tpu.memory_space<vmem>>) attributes {dimension_semantics = [#tpu.dimension_semantics<parallel>, #tpu.dimension_semantics<parallel>], iteration_bounds = array<i64: 2, 2>, scalar_prefetch = 0 : i64, scratch_operands = 0 : i64, tpu.core_type = #tpu.core_type<tc>, window_params = [{transform_indices = @transform_0, window_bounds = array<i64: 1, 1, 10, 16>}, {transform_indices = @transform_1, window_bounds = array<i64: 1, 9, 16>}, {transform_indices = @transform_2, window_bounds = array<i64: 1, 16, 2>}, {transform_indices = @transform_3, window_bounds = array<i64: 1, 16, 2>}, {transform_indices = @transform_4, window_bounds = array<i64: 1, 16, 2>}, {transform_indices = @transform_5, window_bounds = array<i64: 1, 16, 2>}, {transform_indices = @transform_6, window_bounds = array<i64: 1, 1, 2>}, {transform_indices = @transform_7, window_bounds = array<i64: 1, 1, 8, 2>}]} {
    %c0 = arith.constant 0 : index
    %c0_0 = arith.constant 0 : index
    %c0_1 = arith.constant 0 : index
    %c0_2 = arith.constant 0 : index
    %0 = vector.load %arg2[%c0, %c0_0, %c0_1, %c0_2] : memref<1x1x10x16xbf16, #tpu.memory_space<vmem>>, vector<1x1x10x16xbf16>
    %1 = vector.shape_cast %0 : vector<1x1x10x16xbf16> to vector<10x16xbf16>
    %c0_3 = arith.constant 0 : index
    %c0_4 = arith.constant 0 : index
    %c0_5 = arith.constant 0 : index
    %2 = vector.load %arg4[%c0_3, %c0_4, %c0_5] : memref<1x16x2xbf16, #tpu.memory_space<vmem>>, vector<1x16x2xbf16>
    %3 = vector.shape_cast %2 : vector<1x16x2xbf16> to vector<16x2xbf16>
    %c0_6 = arith.constant 0 : index
    %c0_7 = arith.constant 0 : index
    %c0_8 = arith.constant 0 : index
    %4 = vector.load %arg5[%c0_6, %c0_7, %c0_8] : memref<1x16x2xbf16, #tpu.memory_space<vmem>>, vector<1x16x2xbf16>
    %5 = vector.shape_cast %4 : vector<1x16x2xbf16> to vector<16x2xbf16>
    %6 = vector.extract_strided_slice %1 {offsets = [0, 0], sizes = [8, 16], strides = [1, 1]} : vector<10x16xbf16> to vector<8x16xbf16>
    %cst = arith.constant dense<0.000000e+00> : vector<8x2xf32>
    %7 = tpu.matmul %6, %3, %cst {dimension_numbers = #tpu.dot_dimension_numbers<[1], [0], [0], [1], [0, 0, 1, 1], [], []>} : vector<8x16xbf16>, vector<16x2xbf16>, vector<8x2xf32> -> vector<8x2xf32>
    %8 = vector.extract_strided_slice %1 {offsets = [1, 0], sizes = [8, 16], strides = [1, 1]} : vector<10x16xbf16> to vector<8x16xbf16>
    %cst_9 = arith.constant dense<0.000000e+00> : vector<8x2xf32>
    %9 = tpu.matmul %8, %5, %cst_9 {dimension_numbers = #tpu.dot_dimension_numbers<[1], [0], [0], [1], [0, 0, 1, 1], [], []>} : vector<8x16xbf16>, vector<16x2xbf16>, vector<8x2xf32> -> vector<8x2xf32>
    %10 = arith.addf %7, %9 : vector<8x2xf32>
    %c0_10 = arith.constant 0 : index
    %c0_11 = arith.constant 0 : index
    %c0_12 = arith.constant 0 : index
    %11 = vector.load %arg3[%c0_10, %c0_11, %c0_12] : memref<1x9x16xbf16, #tpu.memory_space<vmem>>, vector<1x9x16xbf16>
    %12 = vector.shape_cast %11 : vector<1x9x16xbf16> to vector<9x16xbf16>
    %c0_13 = arith.constant 0 : index
    %c0_14 = arith.constant 0 : index
    %c0_15 = arith.constant 0 : index
    %13 = vector.load %arg6[%c0_13, %c0_14, %c0_15] : memref<1x16x2xbf16, #tpu.memory_space<vmem>>, vector<1x16x2xbf16>
    %14 = vector.shape_cast %13 : vector<1x16x2xbf16> to vector<16x2xbf16>
    %c0_16 = arith.constant 0 : index
    %c0_17 = arith.constant 0 : index
    %c0_18 = arith.constant 0 : index
    %15 = vector.load %arg7[%c0_16, %c0_17, %c0_18] : memref<1x16x2xbf16, #tpu.memory_space<vmem>>, vector<1x16x2xbf16>
    %16 = vector.shape_cast %15 : vector<1x16x2xbf16> to vector<16x2xbf16>
    %17 = vector.extract_strided_slice %12 {offsets = [0, 0], sizes = [8, 16], strides = [1, 1]} : vector<9x16xbf16> to vector<8x16xbf16>
    %cst_19 = arith.constant dense<0.000000e+00> : vector<8x2xf32>
    %18 = tpu.matmul %17, %14, %cst_19 {dimension_numbers = #tpu.dot_dimension_numbers<[1], [0], [0], [1], [0, 0, 1, 1], [], []>} : vector<8x16xbf16>, vector<16x2xbf16>, vector<8x2xf32> -> vector<8x2xf32>
    %19 = vector.extract_strided_slice %12 {offsets = [1, 0], sizes = [8, 16], strides = [1, 1]} : vector<9x16xbf16> to vector<8x16xbf16>
    %cst_20 = arith.constant dense<0.000000e+00> : vector<8x2xf32>
    %20 = tpu.matmul %19, %16, %cst_20 {dimension_numbers = #tpu.dot_dimension_numbers<[1], [0], [0], [1], [0, 0, 1, 1], [], []>} : vector<8x16xbf16>, vector<16x2xbf16>, vector<8x2xf32> -> vector<8x2xf32>
    %21 = arith.addf %18, %20 : vector<8x2xf32>
    %22 = arith.addf %10, %21 : vector<8x2xf32>
    %c0_21 = arith.constant 0 : index
    %c0_22 = arith.constant 0 : index
    %c0_23 = arith.constant 0 : index
    %23 = vector.load %arg8[%c0_21, %c0_22, %c0_23] : memref<1x1x2xf32, #tpu.memory_space<vmem>>, vector<1x1x2xf32>
    %24 = vector.shape_cast %23 : vector<1x1x2xf32> to vector<1x2xf32>
    %25 = vector.broadcast %24 : vector<1x2xf32> to vector<8x2xf32>
    %26 = arith.addf %22, %25 : vector<8x2xf32>
    %cst_24 = arith.constant 0.000000e+00 : f32
    %27 = vector.broadcast %cst_24 : f32 to vector<8x2xf32>
    %28 = arith.subf %27, %26 : vector<8x2xf32>
    %29 = math.exp %28 : vector<8x2xf32>
    %cst_25 = arith.constant 1.000000e+00 : f32
    %30 = vector.broadcast %cst_25 : f32 to vector<8x2xf32>
    %31 = arith.addf %30, %29 : vector<8x2xf32>
    %32 = tpu.reciprocal %31 {approx = true} : vector<8x2xf32> -> vector<8x2xf32>
    %c0_26 = arith.constant 0 : index
    %c0_27 = arith.constant 0 : index
    %c0_28 = arith.constant 0 : index
    %c0_29 = arith.constant 0 : index
    %33 = vector.load %arg9[%c0_26, %c0_27, %c0_28, %c0_29] : memref<1x1x8x2xf32, #tpu.memory_space<vmem>>, vector<1x1x8x2xf32>
    %34 = vector.shape_cast %33 : vector<1x1x8x2xf32> to vector<8x2xf32>
    %35 = vector.shape_cast %32 : vector<8x2xf32> to vector<1x1x8x2xf32>
    tpu.vector_store %arg9[%c0_26, %c0_27, %c0_28, %c0_29], %35 {strides = array<i32>} : memref<1x1x8x2xf32, #tpu.memory_space<vmem>>, vector<1x1x8x2xf32>,
    return
  }
  func.func @transform_0(%arg0: i32, %arg1: i32) -> (i32, i32, i32, i32) {
    %c0_i32 = arith.constant 0 : i32
    %c0_i32_0 = arith.constant 0 : i32
    %c0_i32_1 = arith.constant 0 : i32
    return %arg0, %arg1, %c0_i32, %c0_i32_0 : i32, i32, i32, i32
  }
  func.func @transform_1(%arg0: i32, %arg1: i32) -> (i32, i32, i32) {
    %c0_i32 = arith.constant 0 : i32
    %c0_i32_0 = arith.constant 0 : i32
    %c0_i32_1 = arith.constant 0 : i32
    return %arg1, %c0_i32, %c0_i32_0 : i32, i32, i32
  }
  func.func @transform_2(%arg0: i32, %arg1: i32) -> (i32, i32, i32) {
    %c0_i32 = arith.constant 0 : i32
    %c0_i32_0 = arith.constant 0 : i32
    %c0_i32_1 = arith.constant 0 : i32
    return %arg0, %c0_i32, %c0_i32_0 : i32, i32, i32
  }
  func.func @transform_3(%arg0: i32, %arg1: i32) -> (i32, i32, i32) {
    %c0_i32 = arith.constant 0 : i32
    %c0_i32_0 = arith.constant 0 : i32
    %c0_i32_1 = arith.constant 0 : i32
    return %arg0, %c0_i32, %c0_i32_0 : i32, i32, i32
  }
  func.func @transform_4(%arg0: i32, %arg1: i32) -> (i32, i32, i32) {
    %c0_i32 = arith.constant 0 : i32
    %c0_i32_0 = arith.constant 0 : i32
    %c0_i32_1 = arith.constant 0 : i32
    return %arg0, %c0_i32, %c0_i32_0 : i32, i32, i32
  }
  func.func @transform_5(%arg0: i32, %arg1: i32) -> (i32, i32, i32) {
    %c0_i32 = arith.constant 0 : i32
    %c0_i32_0 = arith.constant 0 : i32
    %c0_i32_1 = arith.constant 0 : i32
    return %arg0, %c0_i32, %c0_i32_0 : i32, i32, i32
  }
  func.func @transform_6(%arg0: i32, %arg1: i32) -> (i32, i32, i32) {
    %c0_i32 = arith.constant 0 : i32
    %c0_i32_0 = arith.constant 0 : i32
    %c0_i32_1 = arith.constant 0 : i32
    return %arg0, %c0_i32, %c0_i32_0 : i32, i32, i32
  }
  func.func @transform_7(%arg0: i32, %arg1: i32) -> (i32, i32, i32, i32) {
    %c0_i32 = arith.constant 0 : i32
    %c0_i32_0 = arith.constant 0 : i32
    %c0_i32_1 = arith.constant 0 : i32
    return %arg0, %arg1, %c0_i32, %c0_i32_0 : i32, i32, i32, i32
  }
}

</mosaic_0001>

<bundles_post_ra>
// kernel: apply_fn.6
= control target key start
LH: loop header
LB: loop body
LE: loop exit
PB: predicated region body
PF: predicated region fallthrough
CT: control target
= control target key end

     0   :  { %s379_s15 = smov 0   ;;  %s405_s0 = inlined_call_operand.vmem [shape: bf16[2,7,2], index: 0, kind: input, shape index: {}]   ;;  %s406_s1 = inlined_call_operand.vmem [shape: bf16[2,16], index: 1, kind: input, shape index: {}]   ;;  %s407_s2 = inlined_call_operand.vmem [shape: bf16[2,16], index: 2, kind: input, shape index: {}]   ;;  %s408_s3 = inlined_call_operand.vmem [shape: f32[1,16], index: 3, kind: input, shape index: {}]   ;;  %s409_s4 = inlined_call_operand.vmem [shape: bf16[2,9,16], index: 4, kind: output, shape index: {}]  }
   0x1 LB: > { %s324_s16 = sadd.s32 4294967295, %s352_s15   ;;  %p328_p0 = scmp.ge.s32.totalorder %s352_s15, 1  ;;  %s352_s15 = sphi %s379_s15, %s14_s15  }
   0x2   : > { %p161_p1 = scmp.lt.s32.totalorder %s352_s15, 3 }
   0x4   : > { %p162_p2 = pnand %p328_p0, %p161_p1 }
   0x5   : > { %p186_p3 = scmp.lt.s32.totalorder (!%p162_p2), %s324_s16, 1 }
   0x6   : > { %165 = sbr.rel (%p162_p2) target bundleno = 163 (0xa3), region = 36 }
   0xb   : > { %v197_v0 = vld [vmem:[%s406_s1] sm:$0x1]  ;;  %vm213_vm0 = vcmask 1040384   ;;  %vm263_vm1 = vcmask 122880   ;;  %vm264_vm2 = vsmask.f32 256 }
   0xc   : > { %v234_v1 = vsel %vm213_vm0, %v197_v0, 0  ;;  %v198_v2 = vld [vmem:[%s407_s2] sm:$0x1]  ;;  %s411_s16 = smov (!%p186_p3, %s324_s16), 1  ;;  %vm209_vm3 = vcmask 15360   ;;  %vm265_vm4 = vmand %vm263_vm1, %vm264_vm2  ;;  %vm257_vm6 = vcmask 1045504  }
   0xd   : > { %243 = vmatpush.bf16.msra.mxu1 %v234_v1  ;;  %v215_v3 = vsel %vm213_vm0, %v198_v2, 0  ;;  %s329_s21 = sshll.u32 %s411_s16, 2  ;;  %s336_s22 = sshll.u32 %s411_s16, 3  ;;  %v345_v15 = vld [vmem:[%s408_s3] ss:$0 sm:$0xff]  ;;  %vm261_vm7 = vcmask 125952  }
   0xe   : > { %224 = vmatpush.bf16.msra.mxu0 %v215_v3  ;;  %s189_s25 = scalar_lea.vmem %s405_s0, %s329_s21  ;;  %s194_s28 = scalar_lea.vmem %s409_s4, %s336_s22 }
   0xf   : > { %v196_v4 = vld [vmem:[%s189_s25] sm:$0xf]  ;;  %v266_v5 = vld [vmem:[%s194_s28 + $0x4] sm:$0x1] }
  0x10   : > { %v200_v6 = vunpack.c.l.b16 %v196_v4  ;;  %333 = vmatmul.msk.bf16.vlgmr.msra.gmra.mxu1 %vm209_vm3, %v196_v4  ;;  %v267_v7 = vsel %vm265_vm4, 0.0|0.0, %v266_v5 }
  0x11   : > { %268 = vst [vmem:[%s194_s28 + $0x4] sm:$0x1] %v267_v7 }
  0x12   : > { %v201_v8 = vpack.c.b16 %v200_v6, %v200_v6 }
  0x14   : > { %v203_v9 = vshrl.u32 %v201_v8, 16  ;;  %v205_v10 = vshll.u32 %v201_v8, 16 }
  0x16   : > { %v207_v11 = vrot.slane %v205_v10, 1 }
  0x18   : > { %v208_v12 = vor.u32 %v207_v11, %v203_v9 }
  0x1a   : > { %332 = vmatmul.msk.bf16.vlgmr.msra.gmra.mxu0 %vm209_vm3, %v208_v12 }
  0x8d   : > { %v245_v13 = vpop.f32.mrf.mxu1 }
  0x95   : > { %v247_v14 = vpop.f32.mrf.mxu1 }
  0x97   : > { %v226_v16 = vpop.f32.mrf.mxu0 }
  0x98   : > { %v246_v17 = vadd.f32 %v245_v13, %v226_v16 }
  0x9a   : > { %v253_v18 = vadd.f32 %v345_v15, %v246_v17 }
  0x9c   : > { %vm254_vm5 = vcmp.ge.f32.partialorder %v253_v18, 0.0  ;;  %v255_v19 = vmul.f32 0.01, %v253_v18 }
  0x9e   : > { %v256_v20 = vsel %vm254_vm5, %v253_v18, %v255_v19 }
  0x9f   : > { %v258_v21 = vsel %vm257_vm6, %v256_v20, 0.0  ;;  %v228_v22 = vpop.f32.mrf.mxu0 }
  0xa0   : > { %v259_v23 = vpack.c.bf16 %v258_v21, %v258_v21 }
  0xa2   : > { %262 = vst.msk [vmem:[%s194_s28] sm:$0xf] %vm261_vm7, %v259_v23 }
  0xa3 PF: > { %s14_s15 = sadd.s32 1, %s352_s15  }
  0xa4   : > { %p11_p4 = scmp.ge.s32.totalorder %s14_s15, 4  }
  0xa6   :  { %13 = sbr.rel (!%p11_p4) target bundleno = 1 (0x1), region = 66 }

// kernel: apply_fn.9
= control target key start
LH: loop header
LB: loop body
LE: loop exit
PB: predicated region body
PF: predicated region fallthrough
CT: control target
= control target key end

     0   :  { %s592_s15 = smov 0   ;;  %s594_s16 = smov 0   ;;  %s652_s0 = inlined_call_operand.vmem [shape: bf16[2,3,16], index: 0, kind: input, shape index: {}]   ;;  %s653_s1 = inlined_call_operand.vmem [shape: bf16[2,16,64], index: 1, kind: input, shape index: {}]   ;;  %s654_s2 = inlined_call_operand.vmem [shape: bf16[2,16,64], index: 2, kind: input, shape index: {}]   ;;  %s655_s3 = inlined_call_operand.vmem [shape: f32[2,1,64], index: 3, kind: input, shape index: {}]   ;;  %s656_s4 = inlined_call_operand.vmem [shape: bf16[2,2,3,64], index: 4, kind: output, shape index: {}]  }
   0x1   :  { %s596_s17 = smov 0   ;;  %s598_s18 = smov 0  }
   0x2   :  { %s600_s19 = smov 0  }
   0x3 LB: > { %s23_s20 = sadd.s32 1, %s557_s17  ;;  %s26_s21 = sadd.s32 1, %s561_s18  ;;  %s565_s19 = sphi %s600_s19, %s14_s19   ;;  %s561_s18 = sphi %s598_s18, %s660_s18   ;;  %s557_s17 = sphi %s596_s17, %s659_s17   ;;  %s553_s16 = sphi %s594_s16, %s658_s16   ;;  %s549_s15 = sphi %s592_s15, %s657_s15  }
   0x4   : > { %p24_p0 = scmp.ge.s32.totalorder %s23_s20, 2  ;;  %p462_p1 = scmp.ge.s32.totalorder %s565_s19, 1 }
   0x5   : > { %p203_p2 = scmp.lt.s32.totalorder %s565_s19, 5 }
   0x6   : > { %s662_s20 = smov (%p24_p0, %s23_s20), 0  ;;  %s664_s21 = smov (!%p24_p0, %s26_s21), %s561_s18 }
   0x7   : > { %p204_p3 = pnand %p462_p1, %p203_p2  ;;  %p28_p4 = scmp.ge.s32.totalorder %s664_s21, 2 }
   0x8   : > { %p248_p5 = scmp.lt.s32.totalorder (!%p204_p3), %s553_s16, 1  ;;  %p244_p6 = scmp.lt.s32.totalorder (!%p204_p3), %s549_s15, 1 }
   0x9   : > { %s666_s21 = smov (%p28_p4, %s664_s21), 0  ;;  %207 = sbr.rel (%p204_p3) target bundleno = 171 (0xab), region = 36 }
   0xe   : > { %s668_s16 = smov (!%p248_p5, %s553_s16), 1  ;;  %s670_s15 = smov (!%p244_p6, %s549_s15), 1  ;;  %vm290_vm0 = vcmask 130048   ;;  %vm336_vm1 = vcmask 1041408   ;;  %vm339_vm3 = vcmask 517120  }
   0xf   : > { %s482_s22 = sshll.u32 %s668_s16, 3  ;;  %s468_s23 = sshll.u32 %s668_s16, 1  ;;  %vm340_vm4 = vsmask.f32 1280 }
  0x10   : > { %s252_s26 = scalar_lea.vmem %s653_s1, %s482_s22  ;;  %s463_s27 = sshll.u32 %s670_s15, 1  ;;  %vm341_vm5 = vmand %vm339_vm3, %vm340_vm4 }
  0x11   : > { %v484_v0 = vld [vmem:[%s252_s26] sm:$0xff]  ;;  %s247_s30 = scalar_lea.vmem %s652_s0, %s463_s27  ;;  %s266_s5 = sadd.s32 %s468_s23, %s670_s15 }
  0x12   : > { %v270_v1 = vld [vmem:[%s247_s30] sm:$0x3]  ;;  %s257_s8 = scalar_lea.vmem %s654_s2, %s482_s22  ;;  %322 = vmatpush.bf16.msra.mxu1 %v484_v0  ;;  %s260_s11 = scalar_lea.vmem %s655_s3, %s668_s16 }
  0x13   : > { %276 = vst [vmem:[#allocation1] ss:$4 sm:$0xff] %v270_v1  ;;  %v485_v2 = vld [vmem:[%s257_s8] sm:$0xff]  ;;  %s469_s12 = sshll.u32 %s266_s5, 1 }
  0x14   : > { %301 = vmatpush.bf16.msra.mxu0 %v485_v2  ;;  %v526_v10 = vld [vmem:[%s260_s11] ss:$0 sm:$0xff]  ;;  %s268_s15 = scalar_lea.vmem %s656_s4, %s469_s12 }
  0x15   : > { %479 = vmatmul.msk.bf16.vlgmr.msra.gmra.mxu1 %vm290_vm0, %v270_v1  ;;  %v342_v16 = vld [vmem:[%s268_s15] sm:$0x3] }
  0x1a   : > { %v277_v3 = vld.sshfl [vmem:[#allocation1] sm:$0xff pattern:$0x73625140] }
  0x1b   : > { %v278_v4 = vshrl.u32 %v277_v3, 16  ;;  %v280_v5 = vshll.u32 %v277_v3, 16 }
  0x1d   : > { %v282_v6 = vrot.slane %v280_v5, 1 }
  0x1f   : > { %v283_v7 = vor.u32 %v282_v6, %v278_v4 }
  0x21   : > { %474 = vmatmul.msk.bf16.vlgmr.msra.gmra.mxu0 %vm290_vm0, %v283_v7 }
  0x92   : > { %v324_v8 = vpop.f32.mrf.mxu1 }
  0x9a   : > { %v326_v9 = vpop.f32.mrf.mxu1 }
  0x9e   : > { %v303_v11 = vpop.f32.mrf.mxu0 }
  0x9f   : > { %v325_v12 = vadd.f32 %v324_v8, %v303_v11 }
  0xa1   : > { %v332_v13 = vadd.f32 %v526_v10, %v325_v12 }
  0xa3   : > { %vm333_vm2 = vcmp.ge.f32.partialorder %v332_v13, 0.0  ;;  %v334_v14 = vmul.f32 0.01, %v332_v13 }
  0xa5   : > { %v335_v15 = vsel %vm333_vm2, %v332_v13, %v334_v14 }
  0xa6   : > { %v337_v17 = vsel %vm336_vm1, %v335_v15, 0.0  ;;  %v305_v18 = vpop.f32.mrf.mxu0 }
  0xa7   : > { %v338_v19 = vpack.c.bf16 %v337_v17, %v337_v17 }
  0xa9   : > { %v343_v20 = vsel %vm341_vm5, %v338_v19, %v342_v16 }
  0xaa   : > { %344 = vst [vmem:[%s268_s15] sm:$0x3] %v343_v20 }
  0xab PF: > { %s14_s19 = sadd.s32 1, %s565_s19   ;;  %s657_s15 = smov %s557_s17 }
  0xac   : > { %p11_p7 = scmp.ge.s32.totalorder %s14_s19, 6   ;;  %s658_s16 = smov %s561_s18 }
  0xad   : > { %s659_s17 = smov %s662_s20  ;;  %s660_s18 = smov %s666_s21 }
  0xae   :  { %13 = sbr.rel (!%p11_p7) target bundleno = 3 (0x3), region = 75 }

// kernel: apply_fn.7
= control target key start
LH: loop header
LB: loop body
LE: loop exit
PB: predicated region body
PF: predicated region fallthrough
CT: control target
= control target key end

     0   :  { %s413_s15 = smov 0   ;;  %s445_s0 = inlined_call_operand.vmem [shape: bf16[2,5,32], index: 0, kind: input, shape index: {}]   ;;  %s446_s1 = inlined_call_operand.vmem [shape: bf16[32,32], index: 1, kind: input, shape index: {}]   ;;  %s447_s2 = inlined_call_operand.vmem [shape: bf16[32,32], index: 2, kind: input, shape index: {}]   ;;  %s448_s3 = inlined_call_operand.vmem [shape: f32[1,32], index: 3, kind: input, shape index: {}]   ;;  %s449_s4 = inlined_call_operand.vmem [shape: bf16[2,5,32], index: 4, kind: output, shape index: {}]  }
   0x1 LB: > { %s340_s16 = sadd.s32 4294967295, %s386_s15   ;;  %p344_p0 = scmp.ge.s32.totalorder %s386_s15, 1  ;;  %s386_s15 = sphi %s413_s15, %s14_s15  }
   0x2   : > { %p161_p1 = scmp.lt.s32.totalorder %s386_s15, 3 }
   0x4   : > { %p162_p2 = pnand %p344_p0, %p161_p1 }
   0x5   : > { %p185_p3 = scmp.lt.s32.totalorder (!%p162_p2), %s340_s16, 1 }
   0x6   : > { %165 = sbr.rel (%p162_p2) target bundleno = 163 (0xa3), region = 36 }
   0xb   : > { %v368_v0 = vld [vmem:[%s446_s1 + $0x8] sm:$0xff]  ;;  %v367_v2 = vld [vmem:[%s446_s1] sm:$0xff]  ;;  %s451_s16 = smov (!%p185_p3, %s340_s16), 1  ;;  %vm225_vm0 = vcmask 261120   ;;  %vm278_vm1 = vcmask 1042432   ;;  %vm281_vm3 = vcmask 256000  }
   0xc   : > { %v370_v1 = vld [vmem:[%s447_s2 + $0x8] sm:$0xff]  ;;  %263 = vmatpush.bf16.msra.mxu1 %v368_v0  ;;  %v369_v3 = vld [vmem:[%s447_s2] sm:$0xff]  ;;  %s345_s25 = sshll.u32 %s451_s16, 2  ;;  %vm282_vm4 = vsmask.f32 2304 }
   0xd   : > { %235 = vmatpush.bf16.msra.mxu0 %v370_v1  ;;  %s188_s28 = scalar_lea.vmem %s445_s0, %s345_s25  ;;  %v379_v12 = vld [vmem:[%s448_s3] ss:$0 sm:$0xff]  ;;  %s192_s7 = scalar_lea.vmem %s449_s4, %s345_s25  ;;  %vm283_vm5 = vmand %vm281_vm3, %vm282_vm4 }
   0xe   : > { %v194_v4 = vld [vmem:[%s188_s28] sm:$0x7] }
   0xf   : > { %v204_v5 = vunpack.c.l.b16 %v194_v4  ;;  %v284_v19 = vld [vmem:[%s192_s7] sm:$0x7] }
  0x10   : > { %264 = vmatpush.bf16.msra.mxu1 %v367_v2 }
  0x11   : > { %236 = vmatpush.bf16.msra.mxu0 %v369_v3  ;;  %v205_v6 = vpack.c.b16 %v204_v5, %v204_v5 }
  0x13   : > { %364 = vmatmul.msk.bf16.vlgmr.msra.gmra.mxu1 %vm225_vm0, %v194_v4  ;;  %v207_v7 = vshrl.u32 %v205_v6, 16  ;;  %v209_v8 = vshll.u32 %v205_v6, 16 }
  0x15   : > { %v211_v9 = vrot.slane %v209_v8, 1 }
  0x17   : > { %v212_v10 = vor.u32 %v211_v9, %v207_v7 }
  0x19   : > { %355 = vmatmul.msk.bf16.vlgmr.msra.gmra.mxu0 %vm225_vm0, %v212_v10 }
  0x90   : > { %v266_v11 = vpop.f32.mrf.mxu1 }
  0x96   : > { %v238_v13 = vpop.f32.mrf.mxu0 }
  0x97   : > { %v267_v15 = vadd.f32 %v266_v11, %v238_v13 }
  0x98   : > { %v268_v14 = vpop.f32.mrf.mxu1 }
  0x99   : > { %v274_v16 = vadd.f32 %v379_v12, %v267_v15 }
  0x9b   : > { %vm275_vm2 = vcmp.ge.f32.partialorder %v274_v16, 0.0  ;;  %v276_v17 = vmul.f32 0.01, %v274_v16 }
  0x9d   : > { %v277_v18 = vsel %vm275_vm2, %v274_v16, %v276_v17 }
  0x9e   : > { %v279_v20 = vsel %vm278_vm1, %v277_v18, 0.0  ;;  %v240_v21 = vpop.f32.mrf.mxu0 }
  0x9f   : > { %v280_v22 = vpack.c.bf16 %v279_v20, %v279_v20 }
  0xa1   : > { %v285_v23 = vsel %vm283_vm5, %v280_v22, %v284_v19 }
  0xa2   : > { %286 = vst [vmem:[%s192_s7] sm:$0x7] %v285_v23 }
  0xa3 PF: > { %s14_s15 = sadd.s32 1, %s386_s15  }
  0xa4   : > { %p11_p4 = scmp.ge.s32.totalorder %s14_s15, 4  }
  0xa6   :  { %13 = sbr.rel (!%p11_p4) target bundleno = 1 (0x1), region = 66 }

// kernel: apply_fn.8
= control target key start
LH: loop header
LB: loop body
LE: loop exit
PB: predicated region body
PF: predicated region fallthrough
CT: control target
= control target key end

     0   :  { %s463_s15 = smov 0   ;;  %s514_s0 = inlined_call_operand.vmem [shape: bf16[2,3,64], index: 0, kind: input, shape index: {}]   ;;  %s515_s1 = inlined_call_operand.vmem [shape: bf16[64,16], index: 1, kind: input, shape index: {}]   ;;  %s516_s2 = inlined_call_operand.vmem [shape: bf16[64,16], index: 2, kind: input, shape index: {}]   ;;  %s517_s3 = inlined_call_operand.vmem [shape: f32[1,16], index: 3, kind: input, shape index: {}]   ;;  %s518_s4 = inlined_call_operand.vmem [shape: bf16[2,3,16], index: 4, kind: output, shape index: {}]  }
   0x1 LB: > { %s370_s16 = sadd.s32 4294967295, %s436_s15   ;;  %p374_p0 = scmp.ge.s32.totalorder %s436_s15, 1  ;;  %s436_s15 = sphi %s463_s15, %s14_s15  }
   0x2   : > { %p161_p1 = scmp.lt.s32.totalorder %s436_s15, 3 }
   0x4   : > { %p162_p2 = pnand %p374_p0, %p161_p1 }
   0x5   : > { %p185_p3 = scmp.lt.s32.totalorder (!%p162_p2), %s370_s16, 1 }
   0x6   : > { %165 = sbr.rel (%p162_p2) target bundleno = 167 (0xa7), region = 36 }
   0xb   : > { %v416_v0 = vld [vmem:[%s515_s1 + $0x18] sm:$0xff]  ;;  %v415_v2 = vld [vmem:[%s515_s1 + $0x10] sm:$0xff]  ;;  %s520_s16 = smov (!%p185_p3, %s370_s16), 1  ;;  %v414_v4 = vld [vmem:[%s515_s1 + $0x8] sm:$0xff]  ;;  %vm244_vm0 = vcmask 523264   ;;  %vm308_vm1 = vcmask 1041408  }
   0xc   : > { %v420_v1 = vld [vmem:[%s516_s2 + $0x18] sm:$0xff]  ;;  %291 = vmatpush.bf16.msra.mxu1 %v416_v0  ;;  %v419_v3 = vld [vmem:[%s516_s2 + $0x10] sm:$0xff]  ;;  %s375_s25 = sshll.u32 %s520_s16, 1  ;;  %v418_v5 = vld [vmem:[%s516_s2 + $0x8] sm:$0xff]  ;;  %vm311_vm3 = vcmask 123904  }
   0xd   : > { %252 = vmatpush.bf16.msra.mxu0 %v420_v1  ;;  %s188_s28 = scalar_lea.vmem %s514_s0, %s375_s25  ;;  %v413_v7 = vld [vmem:[%s515_s1] sm:$0xff]  ;;  %s192_s17 = scalar_lea.vmem %s518_s4, %s375_s25  ;;  %vm312_vm4 = vsmask.f32 1280 }
   0xe   : > { %v194_v6 = vld [vmem:[%s188_s28] sm:$0x3]  ;;  %vm313_vm5 = vmand %vm311_vm3, %vm312_vm4 }
   0xf   : > { %212 = vst [vmem:[#allocation1] ss:$4 sm:$0xff] %v194_v6  ;;  %v417_v8 = vld [vmem:[%s516_s2] sm:$0xff] }
  0x10   : > { %292 = vmatpush.bf16.msra.mxu1 %v415_v2  ;;  %v429_v15 = vld [vmem:[%s517_s3] ss:$0 sm:$0xff] }
  0x11   : > { %253 = vmatpush.bf16.msra.mxu0 %v419_v3  ;;  %v314_v22 = vld [vmem:[%s192_s17] sm:$0x3] }
  0x14   : > { %293 = vmatpush.bf16.msra.mxu1 %v414_v4 }
  0x15   : > { %254 = vmatpush.bf16.msra.mxu0 %v418_v5 }
  0x16   : > { %v213_v9 = vld.sshfl [vmem:[#allocation1] sm:$0xff pattern:$0x73625140] }
  0x17   : > { %v214_v10 = vshrl.u32 %v213_v9, 16  ;;  %v216_v11 = vshll.u32 %v213_v9, 16 }
  0x18   : > { %294 = vmatpush.bf16.msra.mxu1 %v413_v7 }
  0x19   : > { %255 = vmatpush.bf16.msra.mxu0 %v417_v8  ;;  %v218_v12 = vrot.slane %v216_v11, 1 }
  0x1b   : > { %410 = vmatmul.msk.bf16.vlgmr.msra.gmra.mxu1 %vm244_vm0, %v194_v6  ;;  %v219_v13 = vor.u32 %v218_v12, %v214_v10 }
  0x1d   : > { %393 = vmatmul.msk.bf16.vlgmr.msra.gmra.mxu0 %vm244_vm0, %v219_v13 }
  0x98   : > { %v296_v14 = vpop.f32.mrf.mxu1 }
  0x9a   : > { %v257_v16 = vpop.f32.mrf.mxu0 }
  0x9b   : > { %v297_v17 = vadd.f32 %v296_v14, %v257_v16 }
  0x9d   : > { %v304_v18 = vadd.f32 %v429_v15, %v297_v17 }
  0x9f   : > { %vm305_vm2 = vcmp.ge.f32.partialorder %v304_v18, 0.0  ;;  %v306_v20 = vmul.f32 0.01, %v304_v18 }
  0xa0   : > { %v298_v19 = vpop.f32.mrf.mxu1 }
  0xa1   : > { %v307_v21 = vsel %vm305_vm2, %v304_v18, %v306_v20 }
  0xa2   : > { %v309_v23 = vsel %vm308_vm1, %v307_v21, 0.0  ;;  %v259_v24 = vpop.f32.mrf.mxu0 }
  0xa3   : > { %v310_v25 = vpack.c.bf16 %v309_v23, %v309_v23 }
  0xa5   : > { %v315_v26 = vsel %vm313_vm5, %v310_v25, %v314_v22 }
  0xa6   : > { %316 = vst [vmem:[%s192_s17] sm:$0x3] %v315_v26 }
  0xa7 PF: > { %s14_s15 = sadd.s32 1, %s436_s15  }
  0xa8   : > { %p11_p4 = scmp.ge.s32.totalorder %s14_s15, 4  }
  0xaa   :  { %13 = sbr.rel (!%p11_p4) target bundleno = 1 (0x1), region = 66 }

// kernel: squeeze.2
= control target key start
LH: loop header
LB: loop body
LE: loop exit
PB: predicated region body
PF: predicated region fallthrough
CT: control target
= control target key end

     0   :  { %s8_s6 = smov 3  ;;  %s160_s0 = inlined_call_operand.vmem [shape: f32[1,2,8,2], index: 0, kind: input, shape index: {}]   ;;  %s161_s1 = inlined_call_operand.hbm [shape: f32[2,16], index: 1, kind: output, shape index: {}]  }
   0x1   :  { %2 = vsyncpa [#allocation1], 0  ;;  %v74_v0 = vld [vmem:[%s160_s0 + $0x7] ss:$8 sm:%s8_s6]   ;;  %s22_s9 = smov 3  ;;  %s115_s10 = smov 14  }
   0x2   :  { %10 = vrot.lane.b32.xlu0 %v74_v0, %s115_s10  ;;  %v76_v1 = vld [vmem:[%s160_s0 + $0x5] ss:$8 sm:%s22_s9]   ;;  %s116_s13 = smov 10   ;;  %s15_s14 = smov 3  ;;  %vm5_vm0 = vcmask 15360   ;;  %vm12_vm1 = vcmask 130160  }
   0x3   :  { %24 = vrot.lane.b32.xlu1 %v76_v1, %s116_s13  ;;  %s29_s15 = smov 3  ;;  %s36_s16 = smov 3  ;;  %v75_v3 = vld [vmem:[%s160_s0 + $0x6] ss:$8 sm:%s15_s14]   ;;  %vm19_vm2 = vcmask 113760   ;;  %vm26_vm3 = vcmask 97360  }
   0x4   :  { %v78_v2 = vld [vmem:[%s160_s0 + $0x3] ss:$8 sm:%s36_s16]   ;;  %s117_s21 = smov 6   ;;  %v77_v4 = vld [vmem:[%s160_s0 + $0x4] ss:$8 sm:%s29_s15]   ;;  %s43_s24 = smov 3 }
   0x5   :  { %38 = vrot.lane.b32.xlu2 %v78_v2, %s117_s21  ;;  %s118_s25 = smov 12   ;;  %s119_s26 = smov 8   ;;  %v79_v5 = vld [vmem:[%s160_s0 + $0x2] ss:$8 sm:%s43_s24]   ;;  %vm33_vm4 = vcmask 80960   ;;  %vm40_vm5 = vcmask 64560  }
   0x6   :  { %s50_s27 = smov 3  ;;  %s120_s3 = smov 4   ;;  %vm47_vm6 = vcmask 48160   ;;  %vm54_vm7 = vcmask 31760  }
   0x7   :  { %v80_v6 = vld [vmem:[%s160_s0 + $0x1] ss:$8 sm:%s50_s27]   ;;  %s121_s4 = smov 2   ;;  %s3_s5 = smov 3 }
   0x8   :  { %v4_v7 = vld [vmem:[%s160_s0] ss:$8 sm:%s3_s5]   ;;  %s122_s0 = smov [#allocation0]   ;;  %s67_s1 = sshll.u32 %s161_s1, 4  ;;  %s68_s1 = int_to_ptr.hbm [resolvable:$true] %s67_s1 }
   0x9   :  { %6 = vst.msk [vmem:[#allocation2] sm:$0x3] %vm5_vm0, %v4_v7   ;;  %s65_s8 = sshll.u32 %s122_s0, 4  ;;  %s66_s8 = int_to_ptr.vmem [resolvable:$true] %s65_s8 }
   0xa   :  { %17 = vrot.lane.b32.xlu0 %v75_v3, %s118_s25 }
   0xb   :  { %31 = vrot.lane.b32.xlu1 %v77_v4, %s119_s26 }
   0xd   :  { %45 = vrot.lane.b32.xlu2 %v79_v5, %s120_s3 }
  0x12   :  { %52 = vrot.lane.b32.xlu0 %v80_v6, %s121_s4 }
  0x5f   :  { %v39_v8 = vpop.permute.xlu2 %38  }
  0x67   :  { %v46_v9 = vpop.permute.xlu2 %45  }
  0x74   :  { %v11_v10 = vpop.permute.xlu0 %10  }
  0x75   :  { %13 = vst.msk [vmem:[#allocation2] sm:$0x3] %vm12_vm1, %v11_v10   ;;  %v25_v11 = vpop.permute.xlu1 %24  }
  0x7c   :  { %v18_v12 = vpop.permute.xlu0 %17  }
  0x7d   :  { %20 = vst.msk [vmem:[#allocation2] sm:$0x3] %vm19_vm2, %v18_v12   ;;  %v32_v13 = vpop.permute.xlu1 %31  }
  0x7e   :  { %27 = vst.msk [vmem:[#allocation2] sm:$0x3] %vm26_vm3, %v25_v11  }
  0x7f   :  { %34 = vst.msk [vmem:[#allocation2] sm:$0x3] %vm33_vm4, %v32_v13  }
  0x80   :  { %41 = vst.msk [vmem:[#allocation2] sm:$0x3] %vm40_vm5, %v39_v8  }
  0x81   :  { %48 = vst.msk [vmem:[#allocation2] sm:$0x3] %vm47_vm6, %v46_v9  }
  0x84   :  { %v53_v14 = vpop.permute.xlu0 %52  }
  0x85   :  { %55 = vst.msk [vmem:[#allocation2] sm:$0x3] %vm54_vm7, %v53_v14  }
  0x8c   :  { %v58_v15 = vld [vmem:[#allocation2] sm:$0x3] }
  0x8d   :  { %61 = vst [vmem:[#allocation0] sm:$0x3] %v58_v15 }
  0x8e   :  { %70 = dma.vmem_to_hbm [thread:$0]  %s66_s8, 32, %s68_s1, [#allocation1]  }
  0x8f   :  { %113 = dma.done.wait [#allocation1], 32  }
  0x90   :  { %114 = vsyncadd [#allocation1], 4294967264 }
  0x91   :  { %73 = vsyncpa [#allocation1], 1 }

// kernel: apply_fn.10
= control target key start
LH: loop header
LB: loop body
LE: loop exit
PB: predicated region body
PF: predicated region fallthrough
CT: control target
= control target key end

     0   :  { %s935_s24 = smov 0   ;;  %s937_s25 = smov 0   ;;  %s1020_s0 = inlined_call_operand.vmem [shape: bf16[2,2,6,32], index: 0, kind: input, shape index: {}]   ;;  %s1021_s1 = inlined_call_operand.vmem [shape: bf16[2,5,32], index: 1, kind: input, shape index: {}]   ;;  %s1022_s2 = inlined_call_operand.vmem [shape: bf16[2,32,32], index: 2, kind: input, shape index: {}]   ;;  %s1023_s3 = inlined_call_operand.vmem [shape: bf16[2,32,32], index: 3, kind: input, shape index: {}]   ;;  %s1024_s4 = inlined_call_operand.vmem [shape: bf16[2,32,32], index: 4, kind: input, shape index: {}]   ;;  %s1025_s5 = inlined_call_operand.vmem [shape: bf16[2,32,32], index: 5, kind: input, shape index: {}]   ;;  %s1026_s6 = inlined_call_operand.vmem [shape: f32[2,1,32], index: 6, kind: input, shape index: {}]   ;;  %s1027_s7 = inlined_call_operand.vmem [shape: bf16[2,2,5,32], index: 7, kind: output, shape index: {}]  }
   0x1   :  { %s939_s26 = smov 0   ;;  %s941_s27 = smov 0  }
   0x2   :  { %s943_s28 = smov 0  }
   0x3 LB: > { %s26_s29 = sadd.s32 1, %s885_s26  ;;  %s29_s30 = sadd.s32 1, %s889_s27  ;;  %s893_s28 = sphi %s943_s28, %s17_s28   ;;  %s889_s27 = sphi %s941_s27, %s1031_s27   ;;  %s885_s26 = sphi %s939_s26, %s1030_s26   ;;  %s881_s25 = sphi %s937_s25, %s1029_s25   ;;  %s877_s24 = sphi %s935_s24, %s1028_s24  }
   0x4   : > { %p27_p0 = scmp.ge.s32.totalorder %s26_s29, 2  ;;  %p750_p1 = scmp.ge.s32.totalorder %s893_s28, 1 }
   0x5   : > { %p313_p2 = scmp.lt.s32.totalorder %s893_s28, 5 }
   0x6   : > { %s1033_s29 = smov (%p27_p0, %s26_s29), 0  ;;  %s1035_s30 = smov (!%p27_p0, %s29_s30), %s889_s27 }
   0x7   : > { %p314_p3 = pnand %p750_p1, %p313_p2  ;;  %p31_p4 = scmp.ge.s32.totalorder %s1035_s30, 2 }
   0x8   : > { %p378_p5 = scmp.lt.s32.totalorder (!%p314_p3), %s881_s25, 1  ;;  %p380_p6 = scmp.lt.s32.totalorder (!%p314_p3), %s877_s24, 1 }
   0x9   : > { %s1037_s30 = smov (%p31_p4, %s1035_s30), 0  ;;  %317 = sbr.rel (%p314_p3) target bundleno = 178 (0xb2), region = 48 }
   0xe   : > { %s1039_s25 = smov (!%p378_p5, %s881_s25), 1  ;;  %s1041_s24 = smov (!%p380_p6, %s877_s24), 1  ;;  %vm453_vm0 = vcmask 261120   ;;  %vm582_vm1 = vcmask 1043456   ;;  %vm585_vm3 = vcmask 256000  }
   0xf   : > { %s802_s8 = sshll.u32 %s1039_s25, 4  ;;  %s751_s9 = sshll.u32 %s1039_s25, 1  ;;  %vm586_vm4 = vsmask.f32 2304 }
  0x10   : > { %s394_s12 = scalar_lea.vmem %s1022_s2, %s802_s8  ;;  %s404_s15 = scalar_lea.vmem %s1024_s4, %s802_s8  ;;  %vm587_vm5 = vmand %vm585_vm3, %vm586_vm4 }
  0x11   : > { %v807_v0 = vld [vmem:[%s394_s12 + $0x8] sm:$0xff]  ;;  %s409_s18 = scalar_lea.vmem %s1025_s5, %s802_s8  ;;  %s399_s21 = scalar_lea.vmem %s1023_s3, %s802_s8  ;;  %v806_v4 = vld [vmem:[%s394_s12] sm:$0xff] }
  0x12   : > { %v811_v1 = vld [vmem:[%s404_s15 + $0x8] sm:$0xff]  ;;  %s981_s22 = sadd.s32 %s751_s9, %s1041_s24  ;;  %s753_s23 = sshll.u32 %s1041_s24, 2  ;;  %491 = vmatpush.bf16.msra.mxu1 %v807_v0  ;;  %v810_v5 = vld [vmem:[%s404_s15] sm:$0xff] }
  0x13   : > { %v813_v2 = vld [vmem:[%s409_s18 + $0x8] sm:$0xff]  ;;  %566 = vmatpush.bf16.msra.mxu3 %v811_v1  ;;  %s752_s10 = sshll.u32 %s981_s22, 2  ;;  %s389_s14 = scalar_lea.vmem %s1021_s1, %s753_s23  ;;  %v812_v6 = vld [vmem:[%s409_s18] sm:$0xff] }
  0x14   : > { %v809_v3 = vld [vmem:[%s399_s21 + $0x8] sm:$0xff]  ;;  %538 = vmatpush.bf16.msra.mxu2 %v813_v2  ;;  %v808_v7 = vld [vmem:[%s399_s21] sm:$0xff]  ;;  %s385_s16 = scalar_lea.vmem %s1020_s0, %s752_s10  ;;  %s412_s15 = scalar_lea.vmem %s1026_s6, %s1039_s25 }
  0x15   : > { %463 = vmatpush.bf16.msra.mxu0 %v809_v3  ;;  %v498_v8 = vld [vmem:[%s389_s14] sm:$0x7]  ;;  %s420_s18 = scalar_lea.vmem %s1027_s7, %s752_s10 }
  0x16   : > { %v422_v9 = vld [vmem:[%s385_s16] sm:$0x7]  ;;  %v508_v10 = vunpack.c.l.b16 %v498_v8  ;;  %492 = vmatpush.bf16.msra.mxu1 %v806_v4 }
  0x17   : > { %v432_v11 = vunpack.c.l.b16 %v422_v9  ;;  %567 = vmatpush.bf16.msra.mxu3 %v810_v5  ;;  %v854_v29 = vld [vmem:[%s412_s15] ss:$0 sm:$0xff] }
  0x18   : > { %v509_v12 = vpack.c.b16 %v508_v10, %v508_v10  ;;  %539 = vmatpush.bf16.msra.mxu2 %v812_v6  ;;  %v588_v37 = vld [vmem:[%s420_s18] sm:$0x7] }
  0x19   : > { %464 = vmatpush.bf16.msra.mxu0 %v808_v7  ;;  %v433_v13 = vpack.c.b16 %v432_v11, %v432_v11  ;;  %781 = vmatmul.msk.bf16.vlgmr.msra.gmra.mxu1 %vm453_vm0, %v422_v9 }
  0x1a   : > { %v511_v14 = vshrl.u32 %v509_v12, 16  ;;  %v513_v15 = vshll.u32 %v509_v12, 16  ;;  %799 = vmatmul.msk.bf16.vlgmr.msra.gmra.mxu3 %vm453_vm0, %v498_v8 }
  0x1b   : > { %v435_v16 = vshrl.u32 %v433_v13, 16  ;;  %v437_v17 = vshll.u32 %v433_v13, 16 }
  0x1c   : > { %v515_v18 = vrot.slane %v513_v15, 1 }
  0x1d   : > { %v439_v19 = vrot.slane %v437_v17, 1 }
  0x1e   : > { %v516_v20 = vor.u32 %v515_v18, %v511_v14 }
  0x1f   : > { %v440_v21 = vor.u32 %v439_v19, %v435_v16 }
  0x20   : > { %790 = vmatmul.msk.bf16.vlgmr.msra.gmra.mxu2 %vm453_vm0, %v516_v20 }
  0x21   : > { %772 = vmatmul.msk.bf16.vlgmr.msra.gmra.mxu0 %vm453_vm0, %v440_v21 }
  0x96   : > { %v494_v22 = vpop.f32.mrf.mxu1 }
  0x9d   : > { %v569_v24 = vpop.f32.mrf.mxu3 }
  0x9e   : > { %v466_v23 = vpop.f32.mrf.mxu0  ;;  %v496_v25 = vpop.f32.mrf.mxu1 }
  0x9f   : > { %v495_v26 = vadd.f32 %v494_v22, %v466_v23 }
  0xa3   : > { %v541_v27 = vpop.f32.mrf.mxu2 }
  0xa4   : > { %v570_v28 = vadd.f32 %v569_v24, %v541_v27 }
  0xa5   : > { %v571_v32 = vpop.f32.mrf.mxu3 }
  0xa6   : > { %v573_v30 = vadd.f32 %v570_v28, %v495_v26  ;;  %v468_v31 = vpop.f32.mrf.mxu0 }
  0xa8   : > { %v578_v33 = vadd.f32 %v854_v29, %v573_v30 }
  0xaa   : > { %vm579_vm2 = vcmp.ge.f32.partialorder %v578_v33, 0.0  ;;  %v580_v34 = vmul.f32 0.01, %v578_v33 }
  0xab   : > { %v543_v35 = vpop.f32.mrf.mxu2 }
  0xac   : > { %v581_v36 = vsel %vm579_vm2, %v578_v33, %v580_v34 }
  0xad   : > { %v583_v38 = vsel %vm582_vm1, %v581_v36, 0.0 }
  0xae   : > { %v584_v39 = vpack.c.bf16 %v583_v38, %v583_v38 }
  0xb0   : > { %v589_v40 = vsel %vm587_vm5, %v584_v39, %v588_v37 }
  0xb1   : > { %590 = vst [vmem:[%s420_s18] sm:$0x7] %v589_v40 }
  0xb2 PF: > { %s17_s28 = sadd.s32 1, %s893_s28   ;;  %s1028_s24 = smov %s885_s26 }
  0xb3   : > { %p14_p7 = scmp.ge.s32.totalorder %s17_s28, 6   ;;  %s1029_s25 = smov %s889_s27 }
  0xb4   : > { %s1030_s26 = smov %s1033_s29  ;;  %s1031_s27 = smov %s1037_s30 }
  0xb5   :  { %16 = sbr.rel (!%p14_p7) target bundleno = 3 (0x3), region = 96 }

// kernel: apply_fn.11
= control target key start
LH: loop header
LB: loop body
LE: loop exit
PB: predicated region body
PF: predicated region fallthrough
CT: control target
= control target key end

     0   :  { %s910_s24 = smov 0   ;;  %s912_s25 = smov 0   ;;  %s992_s0 = inlined_call_operand.vmem [shape: bf16[2,2,10,16], index: 0, kind: input, shape index: {}]   ;;  %s993_s1 = inlined_call_operand.vmem [shape: bf16[2,9,16], index: 1, kind: input, shape index: {}]   ;;  %s994_s2 = inlined_call_operand.vmem [shape: bf16[2,16,2], index: 2, kind: input, shape index: {}]   ;;  %s995_s3 = inlined_call_operand.vmem [shape: bf16[2,16,2], index: 3, kind: input, shape index: {}]   ;;  %s996_s4 = inlined_call_operand.vmem [shape: bf16[2,16,2], index: 4, kind: input, shape index: {}]   ;;  %s997_s5 = inlined_call_operand.vmem [shape: bf16[2,16,2], index: 5, kind: input, shape index: {}]   ;;  %s998_s6 = inlined_call_operand.vmem [shape: f32[2,1,2], index: 6, kind: input, shape index: {}]   ;;  %s999_s7 = inlined_call_operand.vmem [shape: f32[2,2,8,2], index: 7, kind: output, shape index: {}]  }
   0x1   :  { %s914_s26 = smov 0   ;;  %s916_s27 = smov 0  }
   0x2   :  { %s918_s28 = smov 0  }
   0x3 LB: > { %s26_s29 = sadd.s32 1, %s860_s26  ;;  %s29_s30 = sadd.s32 1, %s864_s27  ;;  %s868_s28 = sphi %s918_s28, %s17_s28   ;;  %s864_s27 = sphi %s916_s27, %s1003_s27   ;;  %s860_s26 = sphi %s914_s26, %s1002_s26   ;;  %s856_s25 = sphi %s912_s25, %s1001_s25   ;;  %s852_s24 = sphi %s910_s24, %s1000_s24  }
   0x4   : > { %p27_p0 = scmp.ge.s32.totalorder %s26_s29, 2  ;;  %p728_p1 = scmp.ge.s32.totalorder %s868_s28, 1 }
   0x5   : > { %p315_p2 = scmp.lt.s32.totalorder %s868_s28, 5 }
   0x6   : > { %s1005_s29 = smov (%p27_p0, %s26_s29), 0  ;;  %s1007_s30 = smov (!%p27_p0, %s29_s30), %s864_s27 }
   0x7   : > { %p316_p3 = pnand %p728_p1, %p315_p2  ;;  %p31_p4 = scmp.ge.s32.totalorder %s1007_s30, 2 }
   0x8   : > { %p382_p5 = scmp.lt.s32.totalorder (!%p316_p3), %s856_s25, 1  ;;  %p384_p6 = scmp.lt.s32.totalorder (!%p316_p3), %s852_s24, 1 }
   0x9   : > { %s1009_s30 = smov (%p31_p4, %s1007_s30), 0  ;;  %319 = sbr.rel (%p316_p3) target bundleno = 189 (0xbd), region = 48 }
   0xe   : > { %s1011_s25 = smov (!%p382_p5, %s856_s25), 1  ;;  %s1013_s24 = smov (!%p384_p6, %s852_s24), 1  ;;  %vm452_vm0 = vcmask 130048   ;;  %vm564_vm1 = vcmask 15360  }
   0xf   : > { %s775_s8 = sshll.u32 %s1011_s25, 3  ;;  %s742_s9 = sshll.u32 %s1011_s25, 1 }
  0x10   : > { %s410_s12 = scalar_lea.vmem %s996_s4, %s775_s8  ;;  %s400_s15 = scalar_lea.vmem %s994_s2, %s775_s8 }
  0x11   : > { %v783_v0 = vld [vmem:[%s410_s12] sm:$0xff]  ;;  %s415_s18 = scalar_lea.vmem %s997_s5, %s775_s8  ;;  %s774_s19 = sshll.u32 %s1013_s24, 3 }
  0x12   : > { %v780_v1 = vld [vmem:[%s400_s15] sm:$0xff]  ;;  %s395_s22 = scalar_lea.vmem %s993_s1, %s774_s19  ;;  %s956_s23 = sadd.s32 %s742_s9, %s1013_s24  ;;  %547 = vmatpush.bf16.msra.mxu3 %v783_v0 }
  0x13   : > { %v784_v2 = vld [vmem:[%s415_s18] sm:$0xff]  ;;  %485 = vmatpush.bf16.msra.mxu1 %v780_v1  ;;  %s729_s10 = sshll.u32 %s1013_s24, 1  ;;  %s730_s11 = sshll.u32 %s1011_s25, 2 }
  0x14   : > { %v491_v3 = vld [vmem:[%s395_s22] sm:$0xf]  ;;  %525 = vmatpush.bf16.msra.mxu2 %v784_v2  ;;  %v782_v5 = vld [vmem:[%s395_s22] sm:$0x10]  ;;  %s388_s12 = sadd.s32 %s730_s11, %s729_s10  ;;  %s405_s15 = scalar_lea.vmem %s995_s3, %s775_s8 }
  0x15   : > { %v760_v4 = vld [vmem:[%s395_s22] sm:$0xf]  ;;  %771 = vmatmul.msk.bf16.vlgmr.msra.gmra.mxu3 %vm452_vm0, %v491_v3  ;;  %s731_s16 = sshll.u32 %s388_s12, 2  ;;  %s418_s19 = scalar_lea.vmem %s998_s6, %s1011_s25 }
  0x16   : > { %v761_v6 = vor.u32 %v782_v5, %v760_v4  ;;  %v781_v7 = vld [vmem:[%s405_s15] sm:$0xff]  ;;  %s390_s18 = scalar_lea.vmem %s992_s0, %s731_s16  ;;  %s743_s25 = sshll.u32 %s956_s23, 3 }
  0x17   : > { %v428_v10 = vld [vmem:[%s390_s18] sm:$0xf]  ;;  %v779_v12 = vld [vmem:[%s390_s18] sm:$0x10]  ;;  %463 = vmatpush.bf16.msra.mxu0 %v781_v7  ;;  %s426_s22 = scalar_lea.vmem %s999_s7, %s743_s25 }
  0x18   : > { %v503_v8 = vshrl.u32 %v761_v6, 16  ;;  %v505_v9 = vshll.u32 %v761_v6, 16  ;;  %v746_v11 = vld [vmem:[%s390_s18] sm:$0xf]  ;;  %757 = vmatmul.msk.bf16.vlgmr.msra.gmra.mxu1 %vm452_vm0, %v428_v10 }
  0x19   : > { %v747_v13 = vor.u32 %v779_v12, %v746_v11  ;;  %v825_v27 = vld [vmem:[%s418_s19] ss:$0 sm:$0xff] }
  0x1a   : > { %v507_v14 = vrot.slane %v505_v9, 1 }
  0x1b   : > { %v440_v16 = vshrl.u32 %v747_v13, 16  ;;  %v442_v17 = vshll.u32 %v747_v13, 16 }
  0x1c   : > { %v508_v15 = vor.u32 %v507_v14, %v503_v8 }
  0x1d   : > { %v444_v18 = vrot.slane %v442_v17, 1 }
  0x1e   : > { %766 = vmatmul.msk.bf16.vlgmr.msra.gmra.mxu2 %vm452_vm0, %v508_v15 }
  0x1f   : > { %v445_v19 = vor.u32 %v444_v18, %v440_v16 }
  0x21   : > { %752 = vmatmul.msk.bf16.vlgmr.msra.gmra.mxu0 %vm452_vm0, %v445_v19 }
  0x95   : > { %v487_v20 = vpop.f32.mrf.mxu1 }
  0x98   : > { %v549_v21 = vpop.f32.mrf.mxu3 }
  0x9d   : > { %v489_v23 = vpop.f32.mrf.mxu1 }
  0x9e   : > { %v465_v22 = vpop.f32.mrf.mxu0 }
  0x9f   : > { %v488_v24 = vadd.f32 %v487_v20, %v465_v22 }
  0xa0   : > { %v551_v28 = vpop.f32.mrf.mxu3 }
  0xa1   : > { %v527_v25 = vpop.f32.mrf.mxu2 }
  0xa2   : > { %v550_v26 = vadd.f32 %v549_v21, %v527_v25 }
  0xa4   : > { %v553_v29 = vadd.f32 %v550_v26, %v488_v24 }
  0xa6   : > { %v558_v30 = vadd.f32 %v825_v27, %v553_v29  ;;  %v467_v31 = vpop.f32.mrf.mxu0 }
  0xa8   : > { %v559_v32 = vsub.f32 0.0, %v558_v30 }
  0xa9   : > { %v529_v33 = vpop.f32.mrf.mxu2 }
  0xaa   : > { %v560_v34 = vmul.f32 1.442695, %v559_v32 }
  0xac   : > { %826 = vpow2.f32 %v560_v34 }
  0xb2   : > { %v827_v35 = vpop.eup %826 }
  0xb3   : > { %v562_v36 = vadd.f32 1.0, %v827_v35 }
  0xb5   : > { %828 = vrcp.f32 %v562_v36 }
  0xbb   : > { %v829_v37 = vpop.eup %828 }
  0xbc   : > { %565 = vst.msk [vmem:[%s426_s22] sm:$0xff] %vm564_vm1, %v829_v37 }
  0xbd PF: > { %s17_s28 = sadd.s32 1, %s868_s28   ;;  %s1000_s24 = smov %s860_s26 }
  0xbe   : > { %p14_p7 = scmp.ge.s32.totalorder %s17_s28, 6   ;;  %s1001_s25 = smov %s864_s27 }
  0xbf   : > { %s1002_s26 = smov %s1005_s29  ;;  %s1003_s27 = smov %s1009_s30 }
  0xc0   :  { %16 = sbr.rel (!%p14_p7) target bundleno = 3 (0x3), region = 96 }

</bundles_post_ra>
